<compile_context>
chip_gen: v7x
topology: tpu7x:2x2x1
jax: 0.10.0
libtpu: 0.0.40
codegen_flags: <defaults>
</compile_context>

<pallas_src>
import functools

import jax
import jax.numpy as jnp
from jax.experimental import pallas as pl
from jax.experimental.pallas import tpu as pltpu


def _round_up(a, b):
    return ((a + b - 1) // b) * b


def _rec_enc_kernel(x_ref, wpblk_ref, wcat_ref, b_ref, out_ref, *, N, P, D, MP):
    """One (batch, channel-tile) block: patch linear + GRU + fused generation."""
    TC = x_ref.shape[-1]
    L = N * P
    ND = N * D

    x = x_ref[...]                                        # (L, TC) f32
    seq_last = x[L - 1:L, :]                              # (1, TC)
    xc = x - seq_last

    # Packed bf16 matmul operands (lane dim = D) and f32 bias/constant columns.
    w_ih = wcat_ref[0:3 * D, :]                           # (3D, D)  bf16
    w_hh = wcat_ref[3 * D:6 * D, :]                       # (3D, D)  bf16
    w_heads = wcat_ref[6 * D:6 * D + 5 * MP, :]           # (5MP, D) bf16

    b_patch = b_ref[0:ND, :]                              # (N*D, 1)
    b_gi = b_ref[ND:ND + 3 * D, :]                        # (3D, 1)  (b_ih + [b_hr; b_hz; 0])
    b_hn = jnp.broadcast_to(b_ref[ND + 3 * D:ND + 4 * D, :], (D, TC))  # hoisted
    o_h = ND + 4 * D
    b_heads = b_ref[o_h:o_h + 5 * MP, :]                  # (5MP, 1)
    ids = b_ref[o_h + 5 * MP:o_h + 6 * MP, :]             # (MP, 1) patch-local step index

    # ---- Patch linear for all N patches in ONE K=L matmul (block-diag W). ----
    enc = jnp.maximum(
        jnp.dot(wpblk_ref[...], xc.astype(jnp.bfloat16),
                preferred_element_type=jnp.float32) + b_patch, 0.0)    # (N*D, TC) f32
    enc_b = enc.astype(jnp.bfloat16)

    # ---- Input-side GRU projections, hoisted off the serial recurrence. ----
    # One (3D, TC) matmul per patch (K = D), stacked along sublanes into a
    # single (N*3D, TC) array; clean sublane slices in the loop below.
    gi = jnp.concatenate(
        [jnp.dot(w_ih, enc_b[t * D:(t + 1) * D, :],
                 preferred_element_type=jnp.float32) + b_gi
         for t in range(N)], axis=0)                                   # (N*3D, TC)

    # ---- GRU recurrence: only h @ W_hh + gating stay serialized. ----
    # Step 0: h0 == 0  =>  W_hh @ h0 == 0, skip the serial matmul.
    gi0 = gi[0:3 * D, :]
    r = jax.nn.sigmoid(gi0[0:D, :])
    z = jax.nn.sigmoid(gi0[D:2 * D, :])
    n = jnp.tanh(gi0[2 * D:3 * D, :] + r * b_hn)
    h = n - z * n                                          # == (1 - z) * n

    for t in range(1, N):                                  # N static & small -> unrolled
        gh = jnp.dot(w_hh, h.astype(jnp.bfloat16),
                     preferred_element_type=jnp.float32)               # (3D, TC)
        gi_t = gi[t * 3 * D:(t + 1) * 3 * D, :]
        r = jax.nn.sigmoid(gi_t[0:D, :] + gh[0:D, :])
        z = jax.nn.sigmoid(gi_t[D:2 * D, :] + gh[D:2 * D, :])
        n = jnp.tanh(gi_t[2 * D:3 * D, :] + r * (gh[2 * D:3 * D, :] + b_hn))
        h = n + z * (h - n)                                # == (1 - z) * n + z * h

    # ---- Fused generation heads: ONE (5MP, D) @ (D, TC) matmul. ----
    heads = jnp.dot(w_heads, h.astype(jnp.bfloat16),
                    preferred_element_type=jnp.float32) + b_heads      # (5MP, TC)
    slope = heads[0:MP, :]
    off = heads[MP:2 * MP, :]
    amp = heads[2 * MP:3 * MP, :]
    freq = heads[3 * MP:4 * MP, :]
    phase = heads[4 * MP:5 * MP, :]
    out_ref[...] = slope * ids + off + amp * jnp.sin(freq * ids + phase) + seq_last


def rec_enc_forward(x, params, *, seq_len, pred_len, patch_len, d_model,
                    channel_tile=128):
    B, L, C = x.shape
    assert L == seq_len and seq_len % patch_len == 0 and pred_len % patch_len == 0
    N = seq_len // patch_len
    M = pred_len // patch_len
    P, D = patch_len, d_model
    MP = M * P                                              # == pred_len
    assert D % 8 == 0 and MP % 8 == 0

    x = x.astype(jnp.float32)

    # Channel tiling: channels ride the lane axis.  Use the full (small) C, or
    # 128-lane tiles (padding C up) so input/output blocks stay lane-dense.
    if C <= channel_tile:
        TC, C_pad = C, C
    else:
        TC = channel_tile
        C_pad = _round_up(C, TC)
        x = jnp.pad(x, ((0, 0), (0, 0), (0, C_pad - C)))

    f32 = lambda a: jnp.asarray(a, jnp.float32)

    # --- Block-diagonal patch weight: one K=L matmul produces all N patch
    # encodings without any in-kernel data reorganisation.
    w_patch_t = f32(params["w_patch"]).T                    # (D, P)
    wpblk = jnp.einsum("nm,dp->ndmp", jnp.eye(N, dtype=jnp.float32),
                       w_patch_t).reshape(N * D, N * P).astype(jnp.bfloat16)

    # --- GRU weights, transposed for the (features on sublanes, channels on
    # lanes) layout; cast to bf16 (f32 accumulation happens in-kernel).
    w_ih_t = f32(params["w_ih"]).T.astype(jnp.bfloat16)     # (3D, D)
    w_hh_t = f32(params["w_hh"]).T.astype(jnp.bfloat16)     # (3D, D)

    # --- Fused generation heads: expand per-segment trend/func params to
    # per-timestep rows and stack slope/offset/amp/freq/phase into one operand.
    W_t, b_t = f32(params["w_trend"]), f32(params["b_trend"])   # (D,2M), (1,2M)
    W_f, b_f = f32(params["w_func"]), f32(params["b_func"])     # (D,4M), (1,4M)
    rep = lambda a: jnp.repeat(a.T, P, axis=0)                  # (D,M)->(MP,D), (1,M)->(MP,1)
    w_heads = jnp.concatenate([
        rep(W_t[:, 0::2]),                                  # slope
        rep(W_t[:, 1::2]) + rep(W_f[:, 3::4]),              # offset (trend b + func d)
        rep(W_f[:, 0::4]),                                  # amplitude
        rep(W_f[:, 1::4]),                                  # frequency
        rep(W_f[:, 2::4]),                                  # phase
    ], axis=0).astype(jnp.bfloat16)                         # (5MP, D)
    b_heads = jnp.concatenate([
        rep(b_t[:, 0::2]),
        rep(b_t[:, 1::2]) + rep(b_f[:, 3::4]),
        rep(b_f[:, 0::4]),
        rep(b_f[:, 1::4]),
        rep(b_f[:, 2::4]),
    ], axis=0)                                              # (5MP, 1)

    w_cat = jnp.concatenate([w_ih_t, w_hh_t, w_heads], axis=0)   # (6D+5MP, D) bf16

    # --- Packed f32 bias / constant columns (row-sliced in-kernel).
    b_patch_rep = jnp.tile(f32(params["b_patch"]).reshape(D, 1), (N, 1))   # (N*D, 1)
    b_ih = f32(params["b_ih"]).reshape(3 * D, 1)
    b_hh = f32(params["b_hh"]).reshape(3 * D, 1)
    # Fold the hidden-side r/z biases into the (once-added) gi bias; only the
    # n-gate hidden bias has to stay inside r * ( . ) in the recurrence.
    b_gi = b_ih.at[0:2 * D, :].add(b_hh[0:2 * D, :])
    b_hn = b_hh[2 * D:3 * D, :]
    ids_col = jnp.tile(jnp.arange(P, dtype=jnp.float32), M).reshape(MP, 1)
    b_all = jnp.concatenate([b_patch_rep, b_gi, b_hn, b_heads, ids_col], axis=0)

    kernel = functools.partial(_rec_enc_kernel, N=N, P=P, D=D, MP=MP)

    # --- Explicit scoped-VMEM budget: double-buffered in/out blocks + packed
    # weights + the enc/gi intermediates (the dominant scratch term).
    lane = max(TC, 128)                                     # sub-128 arrays still pad to full vregs
    interm = 4 * lane * (2 * L + 5 * N * D + 10 * D + 7 * MP)
    blocks = 2 * 4 * lane * (L + MP)
    wbytes = 2 * (wpblk.size * 2 + w_cat.size * 2 + b_all.size * 4 * 128)
    vmem_limit = int(min(48 * 2 ** 20, max(32 * 2 ** 20, 2 * (interm + blocks + wbytes))))
    # TODO(synk): for very large N * d_model the (N*3D, TC) gi intermediate can
    # exceed this budget; chunk the gi precompute over patch groups in that case.

    grid = (B, C_pad // TC)
    # TODO(synk): when B == 1 and C <= 128 the grid has a single step, leaving
    # one v7x TensorCore idle; split the channel tile for that corner case.

    out = pl.pallas_call(
        kernel,
        out_shape=jax.ShapeDtypeStruct((B, MP, C_pad), jnp.float32),
        grid=grid,
        in_specs=[
            pl.BlockSpec((None, L, TC), lambda b, ci: (b, 0, ci)),
            pl.BlockSpec(wpblk.shape, lambda b, ci: (0, 0)),
            pl.BlockSpec(w_cat.shape, lambda b, ci: (0, 0)),
            pl.BlockSpec(b_all.shape, lambda b, ci: (0, 0)),
        ],
        out_specs=pl.BlockSpec((None, MP, TC), lambda b, ci: (b, 0, ci)),
        compiler_params=pltpu.CompilerParams(
            dimension_semantics=("parallel", "parallel"),
            vmem_limit_bytes=vmem_limit),
    )(x, wpblk, w_cat, b_all)

    return out[:, :, :C] if C_pad != C else out


def init_params(key, *, patch_len, d_model, n_pred_steps):
    P, D, M = patch_len, d_model, n_pred_steps
    ks = jax.random.split(key, 8)
    normal = jax.random.normal
    return {
        "w_patch": 0.1 * normal(ks[0], (P, D), jnp.float32),
        "b_patch": 0.1 * normal(ks[1], (1, D), jnp.float32),
        "w_ih":    0.1 * normal(ks[2], (D, 3 * D), jnp.float32),
        "w_hh":    0.1 * normal(ks[3], (D, 3 * D), jnp.float32),
        "b_ih":    0.1 * normal(ks[4], (1, 3 * D), jnp.float32),
        "b_hh":    0.1 * normal(ks[5], (1, 3 * D), jnp.float32),
        # PyTorch __init__ zeroes trend_params and uses N(0, 0.02) for func_params.
        "w_trend": jnp.zeros((D, 2 * M), jnp.float32),
        "b_trend": jnp.zeros((1, 2 * M), jnp.float32),
        "w_func":  0.02 * normal(ks[6], (D, 4 * M), jnp.float32),
        "b_func":  jnp.zeros((1, 4 * M), jnp.float32),
    }


def rec_enc_reference(x, params, *, seq_len, pred_len, patch_len, d_model):
    """Pure-JAX (f32) mirror of the PyTorch forward, for correctness checks."""
    B, L, C = x.shape
    N = seq_len // patch_len
    M = pred_len // patch_len
    P, D = patch_len, d_model
    seq_last = x[:, -1:, :]
    xc = x - seq_last
    xw = jnp.transpose(xc, (0, 2, 1)).reshape(B * C, N, P)
    enc_in = jax.nn.relu(xw @ params["w_patch"] + params["b_patch"][0])
    h = jnp.zeros((B * C, D), jnp.float32)
    for t in range(N):
        xt = enc_in[:, t, :]
        gi = xt @ params["w_ih"] + params["b_ih"][0]
        gh = h @ params["w_hh"] + params["b_hh"][0]
        r = jax.nn.sigmoid(gi[:, :D] + gh[:, :D])
        z = jax.nn.sigmoid(gi[:, D:2 * D] + gh[:, D:2 * D])
        n = jnp.tanh(gi[:, 2 * D:] + r * gh[:, 2 * D:])
        h = (1.0 - z) * n + z * h
    trend = (h @ params["w_trend"] + params["b_trend"][0]).reshape(B * C * M, 2)
    func = (h @ params["w_func"] + params["b_func"][0]).reshape(B * C * M, 4)
    ids = jnp.arange(P, dtype=jnp.float32)[None, :]
    data = trend[:, :1] * ids + trend[:, 1:2]
    data = data + func[:, :1] * jnp.sin(func[:, 1:2] * ids + func[:, 2:3]) + func[:, 3:4]
    data = jnp.transpose(data.reshape(B, C, M * P), (0, 2, 1))
    return data + seq_last


if __name__ == "__main__":
    # Small config consistent with the module.
    B, C = 2, 4
    seq_len, pred_len, patch_len, d_model = 32, 32, 8, 32
    n_pred_steps = pred_len // patch_len

    key = jax.random.PRNGKey(0)
    kx, kp = jax.random.split(key)
    x = jax.random.normal(kx, (B, seq_len, C), jnp.float32)
    params = init_params(kp, patch_len=patch_len, d_model=d_model,
                         n_pred_steps=n_pred_steps)

    y = rec_enc_forward(x, params, seq_len=seq_len, pred_len=pred_len,
                        patch_len=patch_len, d_model=d_model)
    y = jax.block_until_ready(y)

    y_ref = rec_enc_reference(x, params, seq_len=seq_len, pred_len=pred_len,
                              patch_len=patch_len, d_model=d_model)
    assert y.shape == (B, pred_len, C), y.shape
    # bf16 matmul operands (f32 accumulation) vs the pure-f32 reference.
    max_err = jnp.max(jnp.abs(y - y_ref))
    assert jnp.allclose(y, y_ref, atol=2e-2, rtol=2e-2), f"max err {max_err}"

    print("KERNEL_OK")
</pallas_src>

<mosaic_0001>
module attributes {stable_mosaic.version = 11 : i64} {
  func.func @_rec_enc_kernel(%arg0: i32, %arg1: i32, %arg2: memref<1x32x4xf32, #tpu.memory_space<vmem>>, %arg3: memref<128x32xbf16, #tpu.memory_space<vmem>>, %arg4: memref<352x32xbf16, #tpu.memory_space<vmem>>, %arg5: memref<448x1xf32, #tpu.memory_space<vmem>>, %arg6: memref<1x32x4xf32, #tpu.memory_space<vmem>>) attributes {dimension_semantics = [#tpu.dimension_semantics<parallel>, #tpu.dimension_semantics<parallel>], iteration_bounds = array<i64: 2, 1>, scalar_prefetch = 0 : i64, scratch_operands = 0 : i64, tpu.core_type = #tpu.core_type<tc>, window_params = [{transform_indices = @transform_0, window_bounds = array<i64: 1, 32, 4>}, {pipeline_mode = #tpu.pipeline_mode<synchronous>, transform_indices = @transform_1, window_bounds = array<i64: 128, 32>}, {pipeline_mode = #tpu.pipeline_mode<synchronous>, transform_indices = @transform_2, window_bounds = array<i64: 352, 32>}, {pipeline_mode = #tpu.pipeline_mode<synchronous>, transform_indices = @transform_3, window_bounds = array<i64: 448, 1>}, {transform_indices = @transform_4, window_bounds = array<i64: 1, 32, 4>}]} {
    %c0 = arith.constant 0 : index
    %c0_0 = arith.constant 0 : index
    %c0_1 = arith.constant 0 : index
    %0 = vector.load %arg2[%c0, %c0_0, %c0_1] : memref<1x32x4xf32, #tpu.memory_space<vmem>>, vector<1x32x4xf32>
    %1 = vector.shape_cast %0 : vector<1x32x4xf32> to vector<32x4xf32>
    %2 = vector.extract_strided_slice %1 {offsets = [31, 0], sizes = [1, 4], strides = [1, 1]} : vector<32x4xf32> to vector<1x4xf32>
    %3 = vector.broadcast %2 : vector<1x4xf32> to vector<32x4xf32>
    %4 = arith.subf %1, %3 : vector<32x4xf32>
    %c0_2 = arith.constant 0 : index
    %c0_3 = arith.constant 0 : index
    %5 = vector.load %arg4[%c0_2, %c0_3] : memref<352x32xbf16, #tpu.memory_space<vmem>>, vector<96x32xbf16>
    %c96 = arith.constant 96 : index
    %c0_4 = arith.constant 0 : index
    %6 = vector.load %arg4[%c96, %c0_4] : memref<352x32xbf16, #tpu.memory_space<vmem>>, vector<96x32xbf16>
    %c192 = arith.constant 192 : index
    %c0_5 = arith.constant 0 : index
    %7 = vector.load %arg4[%c192, %c0_5] : memref<352x32xbf16, #tpu.memory_space<vmem>>, vector<160x32xbf16>
    %c0_6 = arith.constant 0 : index
    %c0_7 = arith.constant 0 : index
    %8 = vector.load %arg5[%c0_6, %c0_7] : memref<448x1xf32, #tpu.memory_space<vmem>>, vector<128x1xf32>
    %c128 = arith.constant 128 : index
    %c0_8 = arith.constant 0 : index
    %9 = vector.load %arg5[%c128, %c0_8] : memref<448x1xf32, #tpu.memory_space<vmem>>, vector<96x1xf32>
    %c224 = arith.constant 224 : index
    %c0_9 = arith.constant 0 : index
    %10 = vector.load %arg5[%c224, %c0_9] : memref<448x1xf32, #tpu.memory_space<vmem>>, vector<32x1xf32>
    %11 = vector.shape_cast %10 : vector<32x1xf32> to vector<32x1xf32>
    %12 = vector.broadcast %11 : vector<32x1xf32> to vector<32x4xf32>
    %c256 = arith.constant 256 : index
    %c0_10 = arith.constant 0 : index
    %13 = vector.load %arg5[%c256, %c0_10] : memref<448x1xf32, #tpu.memory_space<vmem>>, vector<160x1xf32>
    %c416 = arith.constant 416 : index
    %c0_11 = arith.constant 0 : index
    %14 = vector.load %arg5[%c416, %c0_11] : memref<448x1xf32, #tpu.memory_space<vmem>>, vector<32x1xf32>
    %c0_12 = arith.constant 0 : index
    %c0_13 = arith.constant 0 : index
    %15 = vector.load %arg3[%c0_12, %c0_13] : memref<128x32xbf16, #tpu.memory_space<vmem>>, vector<128x32xbf16>
    %16 = arith.truncf %4 : vector<32x4xf32> to vector<32x4xbf16>
    %cst = arith.constant dense<0.000000e+00> : vector<128x4xf32>
    %17 = tpu.matmul %15, %16, %cst {dimension_numbers = #tpu.dot_dimension_numbers<[1], [0], [0], [1], [0, 0, 1, 1], [], []>} : vector<128x32xbf16>, vector<32x4xbf16>, vector<128x4xf32> -> vector<128x4xf32>
    %18 = vector.broadcast %8 : vector<128x1xf32> to vector<128x4xf32>
    %19 = arith.addf %17, %18 : vector<128x4xf32>
    %cst_14 = arith.constant 0.000000e+00 : f32
    %20 = vector.broadcast %cst_14 : f32 to vector<128x4xf32>
    %21 = arith.maximumf %19, %20 : vector<128x4xf32>
    %22 = arith.truncf %21 : vector<128x4xf32> to vector<128x4xbf16>
    %23 = vector.extract_strided_slice %22 {offsets = [0, 0], sizes = [32, 4], strides = [1, 1]} : vector<128x4xbf16> to vector<32x4xbf16>
    %cst_15 = arith.constant dense<0.000000e+00> : vector<96x4xf32>
    %24 = tpu.matmul %5, %23, %cst_15 {dimension_numbers = #tpu.dot_dimension_numbers<[1], [0], [0], [1], [0, 0, 1, 1], [], []>} : vector<96x32xbf16>, vector<32x4xbf16>, vector<96x4xf32> -> vector<96x4xf32>
    %25 = vector.broadcast %9 : vector<96x1xf32> to vector<96x4xf32>
    %26 = arith.addf %24, %25 : vector<96x4xf32>
    %27 = vector.extract_strided_slice %22 {offsets = [32, 0], sizes = [32, 4], strides = [1, 1]} : vector<128x4xbf16> to vector<32x4xbf16>
    %cst_16 = arith.constant dense<0.000000e+00> : vector<96x4xf32>
    %28 = tpu.matmul %5, %27, %cst_16 {dimension_numbers = #tpu.dot_dimension_numbers<[1], [0], [0], [1], [0, 0, 1, 1], [], []>} : vector<96x32xbf16>, vector<32x4xbf16>, vector<96x4xf32> -> vector<96x4xf32>
    %29 = vector.broadcast %9 : vector<96x1xf32> to vector<96x4xf32>
    %30 = arith.addf %28, %29 : vector<96x4xf32>
    %31 = vector.extract_strided_slice %22 {offsets = [64, 0], sizes = [32, 4], strides = [1, 1]} : vector<128x4xbf16> to vector<32x4xbf16>
    %cst_17 = arith.constant dense<0.000000e+00> : vector<96x4xf32>
    %32 = tpu.matmul %5, %31, %cst_17 {dimension_numbers = #tpu.dot_dimension_numbers<[1], [0], [0], [1], [0, 0, 1, 1], [], []>} : vector<96x32xbf16>, vector<32x4xbf16>, vector<96x4xf32> -> vector<96x4xf32>
    %33 = vector.broadcast %9 : vector<96x1xf32> to vector<96x4xf32>
    %34 = arith.addf %32, %33 : vector<96x4xf32>
    %35 = vector.extract_strided_slice %22 {offsets = [96, 0], sizes = [32, 4], strides = [1, 1]} : vector<128x4xbf16> to vector<32x4xbf16>
    %cst_18 = arith.constant dense<0.000000e+00> : vector<96x4xf32>
    %36 = tpu.matmul %5, %35, %cst_18 {dimension_numbers = #tpu.dot_dimension_numbers<[1], [0], [0], [1], [0, 0, 1, 1], [], []>} : vector<96x32xbf16>, vector<32x4xbf16>, vector<96x4xf32> -> vector<96x4xf32>
    %37 = vector.broadcast %9 : vector<96x1xf32> to vector<96x4xf32>
    %38 = arith.addf %36, %37 : vector<96x4xf32>
    %39 = tpu.concatenate %26, %30, %34, %38 in 0 : vector<96x4xf32>, vector<96x4xf32>, vector<96x4xf32>, vector<96x4xf32> -> vector<384x4xf32>
    %40 = vector.extract_strided_slice %39 {offsets = [0, 0], sizes = [96, 4], strides = [1, 1]} : vector<384x4xf32> to vector<96x4xf32>
    %41 = vector.extract_strided_slice %40 {offsets = [0, 0], sizes = [32, 4], strides = [1, 1]} : vector<96x4xf32> to vector<32x4xf32>
    %42 = arith.negf %41 : vector<32x4xf32>
    %43 = math.exp %42 : vector<32x4xf32>
    %cst_19 = arith.constant 1.000000e+00 : f32
    %44 = vector.broadcast %cst_19 : f32 to vector<32x4xf32>
    %45 = arith.addf %44, %43 : vector<32x4xf32>
    %46 = arith.divf %44, %45 : vector<32x4xf32>
    %47 = vector.extract_strided_slice %40 {offsets = [32, 0], sizes = [32, 4], strides = [1, 1]} : vector<96x4xf32> to vector<32x4xf32>
    %48 = arith.negf %47 : vector<32x4xf32>
    %49 = math.exp %48 : vector<32x4xf32>
    %cst_20 = arith.constant 1.000000e+00 : f32
    %50 = vector.broadcast %cst_20 : f32 to vector<32x4xf32>
    %51 = arith.addf %50, %49 : vector<32x4xf32>
    %52 = arith.divf %50, %51 : vector<32x4xf32>
    %53 = vector.extract_strided_slice %40 {offsets = [64, 0], sizes = [32, 4], strides = [1, 1]} : vector<96x4xf32> to vector<32x4xf32>
    %54 = arith.mulf %46, %12 : vector<32x4xf32>
    %55 = arith.addf %53, %54 : vector<32x4xf32>
    %56 = math.tanh %55 : vector<32x4xf32>
    %57 = arith.mulf %52, %56 : vector<32x4xf32>
    %58 = arith.subf %56, %57 : vector<32x4xf32>
    %59 = arith.truncf %58 : vector<32x4xf32> to vector<32x4xbf16>
    %cst_21 = arith.constant dense<0.000000e+00> : vector<96x4xf32>
    %60 = tpu.matmul %6, %59, %cst_21 {dimension_numbers = #tpu.dot_dimension_numbers<[1], [0], [0], [1], [0, 0, 1, 1], [], []>} : vector<96x32xbf16>, vector<32x4xbf16>, vector<96x4xf32> -> vector<96x4xf32>
    %61 = vector.extract_strided_slice %39 {offsets = [96, 0], sizes = [96, 4], strides = [1, 1]} : vector<384x4xf32> to vector<96x4xf32>
    %62 = vector.extract_strided_slice %61 {offsets = [0, 0], sizes = [32, 4], strides = [1, 1]} : vector<96x4xf32> to vector<32x4xf32>
    %63 = vector.extract_strided_slice %60 {offsets = [0, 0], sizes = [32, 4], strides = [1, 1]} : vector<96x4xf32> to vector<32x4xf32>
    %64 = arith.addf %62, %63 : vector<32x4xf32>
    %65 = arith.negf %64 : vector<32x4xf32>
    %66 = math.exp %65 : vector<32x4xf32>
    %cst_22 = arith.constant 1.000000e+00 : f32
    %67 = vector.broadcast %cst_22 : f32 to vector<32x4xf32>
    %68 = arith.addf %67, %66 : vector<32x4xf32>
    %69 = arith.divf %67, %68 : vector<32x4xf32>
    %70 = vector.extract_strided_slice %61 {offsets = [32, 0], sizes = [32, 4], strides = [1, 1]} : vector<96x4xf32> to vector<32x4xf32>
    %71 = vector.extract_strided_slice %60 {offsets = [32, 0], sizes = [32, 4], strides = [1, 1]} : vector<96x4xf32> to vector<32x4xf32>
    %72 = arith.addf %70, %71 : vector<32x4xf32>
    %73 = arith.negf %72 : vector<32x4xf32>
    %74 = math.exp %73 : vector<32x4xf32>
    %cst_23 = arith.constant 1.000000e+00 : f32
    %75 = vector.broadcast %cst_23 : f32 to vector<32x4xf32>
    %76 = arith.addf %75, %74 : vector<32x4xf32>
    %77 = arith.divf %75, %76 : vector<32x4xf32>
    %78 = vector.extract_strided_slice %61 {offsets = [64, 0], sizes = [32, 4], strides = [1, 1]} : vector<96x4xf32> to vector<32x4xf32>
    %79 = vector.extract_strided_slice %60 {offsets = [64, 0], sizes = [32, 4], strides = [1, 1]} : vector<96x4xf32> to vector<32x4xf32>
    %80 = arith.addf %79, %12 : vector<32x4xf32>
    %81 = arith.mulf %69, %80 : vector<32x4xf32>
    %82 = arith.addf %78, %81 : vector<32x4xf32>
    %83 = math.tanh %82 : vector<32x4xf32>
    %84 = arith.subf %58, %83 : vector<32x4xf32>
    %85 = arith.mulf %77, %84 : vector<32x4xf32>
    %86 = arith.addf %83, %85 : vector<32x4xf32>
    %87 = arith.truncf %86 : vector<32x4xf32> to vector<32x4xbf16>
    %cst_24 = arith.constant dense<0.000000e+00> : vector<96x4xf32>
    %88 = tpu.matmul %6, %87, %cst_24 {dimension_numbers = #tpu.dot_dimension_numbers<[1], [0], [0], [1], [0, 0, 1, 1], [], []>} : vector<96x32xbf16>, vector<32x4xbf16>, vector<96x4xf32> -> vector<96x4xf32>
    %89 = vector.extract_strided_slice %39 {offsets = [192, 0], sizes = [96, 4], strides = [1, 1]} : vector<384x4xf32> to vector<96x4xf32>
    %90 = vector.extract_strided_slice %89 {offsets = [0, 0], sizes = [32, 4], strides = [1, 1]} : vector<96x4xf32> to vector<32x4xf32>
    %91 = vector.extract_strided_slice %88 {offsets = [0, 0], sizes = [32, 4], strides = [1, 1]} : vector<96x4xf32> to vector<32x4xf32>
    %92 = arith.addf %90, %91 : vector<32x4xf32>
    %93 = arith.negf %92 : vector<32x4xf32>
    %94 = math.exp %93 : vector<32x4xf32>
    %cst_25 = arith.constant 1.000000e+00 : f32
    %95 = vector.broadcast %cst_25 : f32 to vector<32x4xf32>
    %96 = arith.addf %95, %94 : vector<32x4xf32>
    %97 = arith.divf %95, %96 : vector<32x4xf32>
    %98 = vector.extract_strided_slice %89 {offsets = [32, 0], sizes = [32, 4], strides = [1, 1]} : vector<96x4xf32> to vector<32x4xf32>
    %99 = vector.extract_strided_slice %88 {offsets = [32, 0], sizes = [32, 4], strides = [1, 1]} : vector<96x4xf32> to vector<32x4xf32>
    %100 = arith.addf %98, %99 : vector<32x4xf32>
    %101 = arith.negf %100 : vector<32x4xf32>
    %102 = math.exp %101 : vector<32x4xf32>
    %cst_26 = arith.constant 1.000000e+00 : f32
    %103 = vector.broadcast %cst_26 : f32 to vector<32x4xf32>
    %104 = arith.addf %103, %102 : vector<32x4xf32>
    %105 = arith.divf %103, %104 : vector<32x4xf32>
    %106 = vector.extract_strided_slice %89 {offsets = [64, 0], sizes = [32, 4], strides = [1, 1]} : vector<96x4xf32> to vector<32x4xf32>
    %107 = vector.extract_strided_slice %88 {offsets = [64, 0], sizes = [32, 4], strides = [1, 1]} : vector<96x4xf32> to vector<32x4xf32>
    %108 = arith.addf %107, %12 : vector<32x4xf32>
    %109 = arith.mulf %97, %108 : vector<32x4xf32>
    %110 = arith.addf %106, %109 : vector<32x4xf32>
    %111 = math.tanh %110 : vector<32x4xf32>
    %112 = arith.subf %86, %111 : vector<32x4xf32>
    %113 = arith.mulf %105, %112 : vector<32x4xf32>
    %114 = arith.addf %111, %113 : vector<32x4xf32>
    %115 = arith.truncf %114 : vector<32x4xf32> to vector<32x4xbf16>
    %cst_27 = arith.constant dense<0.000000e+00> : vector<96x4xf32>
    %116 = tpu.matmul %6, %115, %cst_27 {dimension_numbers = #tpu.dot_dimension_numbers<[1], [0], [0], [1], [0, 0, 1, 1], [], []>} : vector<96x32xbf16>, vector<32x4xbf16>, vector<96x4xf32> -> vector<96x4xf32>
    %117 = vector.extract_strided_slice %39 {offsets = [288, 0], sizes = [96, 4], strides = [1, 1]} : vector<384x4xf32> to vector<96x4xf32>
    %118 = vector.extract_strided_slice %117 {offsets = [0, 0], sizes = [32, 4], strides = [1, 1]} : vector<96x4xf32> to vector<32x4xf32>
    %119 = vector.extract_strided_slice %116 {offsets = [0, 0], sizes = [32, 4], strides = [1, 1]} : vector<96x4xf32> to vector<32x4xf32>
    %120 = arith.addf %118, %119 : vector<32x4xf32>
    %121 = arith.negf %120 : vector<32x4xf32>
    %122 = math.exp %121 : vector<32x4xf32>
    %cst_28 = arith.constant 1.000000e+00 : f32
    %123 = vector.broadcast %cst_28 : f32 to vector<32x4xf32>
    %124 = arith.addf %123, %122 : vector<32x4xf32>
    %125 = arith.divf %123, %124 : vector<32x4xf32>
    %126 = vector.extract_strided_slice %117 {offsets = [32, 0], sizes = [32, 4], strides = [1, 1]} : vector<96x4xf32> to vector<32x4xf32>
    %127 = vector.extract_strided_slice %116 {offsets = [32, 0], sizes = [32, 4], strides = [1, 1]} : vector<96x4xf32> to vector<32x4xf32>
    %128 = arith.addf %126, %127 : vector<32x4xf32>
    %129 = arith.negf %128 : vector<32x4xf32>
    %130 = math.exp %129 : vector<32x4xf32>
    %cst_29 = arith.constant 1.000000e+00 : f32
    %131 = vector.broadcast %cst_29 : f32 to vector<32x4xf32>
    %132 = arith.addf %131, %130 : vector<32x4xf32>
    %133 = arith.divf %131, %132 : vector<32x4xf32>
    %134 = vector.extract_strided_slice %117 {offsets = [64, 0], sizes = [32, 4], strides = [1, 1]} : vector<96x4xf32> to vector<32x4xf32>
    %135 = vector.extract_strided_slice %116 {offsets = [64, 0], sizes = [32, 4], strides = [1, 1]} : vector<96x4xf32> to vector<32x4xf32>
    %136 = arith.addf %135, %12 : vector<32x4xf32>
    %137 = arith.mulf %125, %136 : vector<32x4xf32>
    %138 = arith.addf %134, %137 : vector<32x4xf32>
    %139 = math.tanh %138 : vector<32x4xf32>
    %140 = arith.subf %114, %139 : vector<32x4xf32>
    %141 = arith.mulf %133, %140 : vector<32x4xf32>
    %142 = arith.addf %139, %141 : vector<32x4xf32>
    %143 = arith.truncf %142 : vector<32x4xf32> to vector<32x4xbf16>
    %cst_30 = arith.constant dense<0.000000e+00> : vector<160x4xf32>
    %144 = tpu.matmul %7, %143, %cst_30 {dimension_numbers = #tpu.dot_dimension_numbers<[1], [0], [0], [1], [0, 0, 1, 1], [], []>} : vector<160x32xbf16>, vector<32x4xbf16>, vector<160x4xf32> -> vector<160x4xf32>
    %145 = vector.broadcast %13 : vector<160x1xf32> to vector<160x4xf32>
    %146 = arith.addf %144, %145 : vector<160x4xf32>
    %147 = vector.extract_strided_slice %146 {offsets = [0, 0], sizes = [32, 4], strides = [1, 1]} : vector<160x4xf32> to vector<32x4xf32>
    %148 = vector.extract_strided_slice %146 {offsets = [32, 0], sizes = [32, 4], strides = [1, 1]} : vector<160x4xf32> to vector<32x4xf32>
    %149 = vector.extract_strided_slice %146 {offsets = [64, 0], sizes = [32, 4], strides = [1, 1]} : vector<160x4xf32> to vector<32x4xf32>
    %150 = vector.extract_strided_slice %146 {offsets = [96, 0], sizes = [32, 4], strides = [1, 1]} : vector<160x4xf32> to vector<32x4xf32>
    %151 = vector.extract_strided_slice %146 {offsets = [128, 0], sizes = [32, 4], strides = [1, 1]} : vector<160x4xf32> to vector<32x4xf32>
    %152 = vector.broadcast %14 : vector<32x1xf32> to vector<32x4xf32>
    %153 = arith.mulf %147, %152 : vector<32x4xf32>
    %154 = arith.addf %153, %148 : vector<32x4xf32>
    %155 = vector.broadcast %14 : vector<32x1xf32> to vector<32x4xf32>
    %156 = arith.mulf %150, %155 : vector<32x4xf32>
    %157 = arith.addf %156, %151 : vector<32x4xf32>
    %158 = math.sin %157 : vector<32x4xf32>
    %159 = arith.mulf %149, %158 : vector<32x4xf32>
    %160 = arith.addf %154, %159 : vector<32x4xf32>
    %161 = vector.broadcast %2 : vector<1x4xf32> to vector<32x4xf32>
    %162 = arith.addf %160, %161 : vector<32x4xf32>
    %c0_31 = arith.constant 0 : index
    %c0_32 = arith.constant 0 : index
    %c0_33 = arith.constant 0 : index
    %163 = vector.load %arg6[%c0_31, %c0_32, %c0_33] : memref<1x32x4xf32, #tpu.memory_space<vmem>>, vector<1x32x4xf32>
    %164 = vector.shape_cast %163 : vector<1x32x4xf32> to vector<32x4xf32>
    %165 = vector.shape_cast %162 : vector<32x4xf32> to vector<1x32x4xf32>
    tpu.vector_store %arg6[%c0_31, %c0_32, %c0_33], %165 {strides = array<i32>} : memref<1x32x4xf32, #tpu.memory_space<vmem>>, vector<1x32x4xf32>,
    return
  }
  func.func @transform_0(%arg0: i32, %arg1: i32) -> (i32, i32, i32) {
    %c0_i32 = arith.constant 0 : i32
    %c0_i32_0 = arith.constant 0 : i32
    return %arg0, %c0_i32, %arg1 : i32, i32, i32
  }
  func.func @transform_1(%arg0: i32, %arg1: i32) -> (i32, i32) {
    %c0_i32 = arith.constant 0 : i32
    %c0_i32_0 = arith.constant 0 : i32
    %c0_i32_1 = arith.constant 0 : i32
    return %c0_i32, %c0_i32_0 : i32, i32
  }
  func.func @transform_2(%arg0: i32, %arg1: i32) -> (i32, i32) {
    %c0_i32 = arith.constant 0 : i32
    %c0_i32_0 = arith.constant 0 : i32
    %c0_i32_1 = arith.constant 0 : i32
    return %c0_i32, %c0_i32_0 : i32, i32
  }
  func.func @transform_3(%arg0: i32, %arg1: i32) -> (i32, i32) {
    %c0_i32 = arith.constant 0 : i32
    %c0_i32_0 = arith.constant 0 : i32
    %c0_i32_1 = arith.constant 0 : i32
    return %c0_i32, %c0_i32_0 : i32, i32
  }
  func.func @transform_4(%arg0: i32, %arg1: i32) -> (i32, i32, i32) {
    %c0_i32 = arith.constant 0 : i32
    %c0_i32_0 = arith.constant 0 : i32
    return %arg0, %c0_i32, %arg1 : i32, i32, i32
  }
}

</mosaic_0001>

<bundles_post_ra>
// kernel: tpu_custom_call.1
= control target key start
LH: loop header
LB: loop body
LE: loop exit
PB: predicated region body
PF: predicated region fallthrough
CT: control target
= control target key end

     0   :  { %s3286_s15 = smov 0   ;;  %s3288_s16 = smov 0   ;;  %s4214_s0 = inlined_call_operand.vmem [shape: f32[2,32,4], index: 0, kind: input, shape index: {}]   ;;  %s4215_s1 = inlined_call_operand.vmem [shape: bf16[128,32], index: 1, kind: input, shape index: {}]   ;;  %s4216_s2 = inlined_call_operand.vmem [shape: bf16[352,32], index: 2, kind: input, shape index: {}]   ;;  %s4217_s3 = inlined_call_operand.vmem [shape: f32[448,1], index: 3, kind: input, shape index: {}]   ;;  %s4218_s4 = inlined_call_operand.vmem [shape: f32[2,32,4], index: 4, kind: output, shape index: {}]  }
   0x1   :  { %s3290_s17 = smov 0  }
   0x2 LB: > { %s26_s18 = sadd.s32 1, %s3248_s16  ;;  %p2546_p0 = scmp.ge.s32.totalorder %s3252_s17, 1  ;;  %s3252_s17 = sphi %s3290_s17, %s14_s17   ;;  %s3248_s16 = sphi %s3288_s16, %s4224_s16   ;;  %s3244_s15 = sphi %s3286_s15, %s4223_s15  }
   0x3   : > { %p28_p1 = scmp.ge.s32.totalorder %s26_s18, 2  ;;  %p181_p2 = scmp.lt.s32.totalorder %s3252_s17, 3 }
   0x5   : > { %s4226_s18 = smov (%p28_p1, %s26_s18), 0  ;;  %p182_p3 = pnand %p2546_p0, %p181_p2 }
   0x6   : > { %v288_v0 = vld [vmem:[%s4217_s3 + $0x10] sm:$0xff] (!%p182_p3)  ;;  %v286_v1 = vld [vmem:[%s4217_s3] sm:$0xff] (!%p182_p3)  ;;  %p213_p4 = scmp.lt.s32.totalorder (!%p182_p3), %s3244_s15, 1  ;;  %v234_v2 = vlaneseq (!%p182_p3)  ;;  %v3254_v3 = vmov (!%p182_p3), 0   ;;  %v289_v4 = vld [vmem:[%s4217_s3 + $0x18] sm:$0xff] (!%p182_p3)  ;;  %vm500_vm0 = vcmask (!%p182_p3), 261120  }
   0x7   : > { %185 = sbr.rel (%p182_p3) target bundleno = 1748 (0x6d4), region = 36  ;;  %3023 = vset.pattern.permute.xlu1 (!%p182_p3), %v3254_v3  ;;  %3022 = vset.pattern.permute.xlu0 (!%p182_p3), %v3254_v3  ;;  %v287_v6 = vld [vmem:[%s4217_s3 + $0x8] sm:$0xff] (!%p182_p3)  ;;  %v3024_v8 = vld [vmem:[%s4215_s1] sm:$0xff] (!%p182_p3)   ;;  %v293_v20 = vld [vmem:[%s4217_s3 + $0x38] sm:$0xff] (!%p182_p3) }
   0x8   : > { %392 = vperm.xlu1 (!%p182_p3), %3023, %v288_v0   ;;  %382 = vperm.xlu0 (!%p182_p3), %3022, %v286_v1   ;;  %v235_v5 = vshrl.u32 (!%p182_p3), %v234_v2, 7  ;;  %v291_v12 = vld [vmem:[%s4217_s3 + $0x28] sm:$0xff] (!%p182_p3)  ;;  %v290_v13 = vld [vmem:[%s4217_s3 + $0x20] sm:$0xff] (!%p182_p3)  ;;  %v292_v22 = vld [vmem:[%s4217_s3 + $0x30] sm:$0xff] (!%p182_p3) }
   0x9   : > { %2775 = vmatprep.mubr.msk.bf16.mxu0 (!%p182_p3), %vm500_vm0, %v3024_v8  ;;  %v303_v24 = vld [vmem:[%s4217_s3 + $0x88] sm:$0xff] (!%p182_p3)  ;;  %v302_v25 = vld [vmem:[%s4217_s3 + $0x80] sm:$0xff] (!%p182_p3)  ;;  %v305_v27 = vld [vmem:[%s4217_s3 + $0x98] sm:$0xff] (!%p182_p3) }
   0xa   : > { %v236_v7 = vsub.s32 (!%p182_p3), 7, %v235_v5  ;;  %v3025_v26 = vld [vmem:[%s4215_s1 + $0x8] sm:$0xff] (!%p182_p3)   ;;  %v3026_v28 = vld [vmem:[%s4215_s1 + $0x10] sm:$0xff] (!%p182_p3)   ;;  %v306_v31 = vld [vmem:[%s4217_s3 + $0xa0] sm:$0xff] (!%p182_p3) }
   0xb   : > { %v304_v29 = vld [vmem:[%s4217_s3 + $0x90] sm:$0xff] (!%p182_p3)  ;;  %v307_v30 = vld [vmem:[%s4217_s3 + $0xa8] sm:$0xff] (!%p182_p3)  ;;  %v3027_v32 = vld [vmem:[%s4215_s1 + $0x18] sm:$0xff] (!%p182_p3)  }
   0xc   : > { %397 = vperm.xlu1 (!%p182_p3), %3023, %v289_v4   ;;  %387 = vperm.xlu0 (!%p182_p3), %3022, %v287_v6   ;;  %v299_v33 = vld [vmem:[%s4217_s3 + $0x68] sm:$0xff] (!%p182_p3)  ;;  %v298_v34 = vld [vmem:[%s4217_s3 + $0x60] sm:$0xff] (!%p182_p3)  ;;  %v309_v36 = vld [vmem:[%s4217_s3 + $0xb8] sm:$0xff] (!%p182_p3) }
   0xd   : > { %v3028_v35 = vld [vmem:[%s4215_s1 + $0x20] sm:$0xff] (!%p182_p3)   ;;  %v308_v37 = vld [vmem:[%s4217_s3 + $0xb0] sm:$0xff] (!%p182_p3)  ;;  %v3029_v38 = vld [vmem:[%s4215_s1 + $0x28] sm:$0xff] (!%p182_p3)  }
   0xe   : > { %s4228_s15 = smov (!%p213_p4, %s3244_s15), 1  ;;  %v301_v39 = vld [vmem:[%s4217_s3 + $0x78] sm:$0xff]  ;;  %v3030_v40 = vld [vmem:[%s4215_s1 + $0x30] sm:$0xff]   ;;  %v315_v42 = vld [vmem:[%s4217_s3 + $0xe8] sm:$0xff] }
   0xf   : > { %s2691_s27 = sshll.u32 %s4228_s15, 5  ;;  %v300_v41 = vld [vmem:[%s4217_s3 + $0x70] sm:$0xff]  ;;  %v314_v43 = vld [vmem:[%s4217_s3 + $0xe0] sm:$0xff]  ;;  %v3031_v44 = vld [vmem:[%s4215_s1 + $0x38] sm:$0xff]  }
  0x10   : > { %s220_s6 = scalar_lea.vmem %s4214_s0, %s2691_s27  ;;  %407 = vperm.xlu1 %3023, %v291_v12   ;;  %402 = vperm.xlu0 %3022, %v290_v13   ;;  %v311_v45 = vld [vmem:[%s4217_s3 + $0xc8] sm:$0xff]  ;;  %v310_v46 = vld [vmem:[%s4217_s3 + $0xc0] sm:$0xff]  ;;  %v317_v47 = vld [vmem:[%s4217_s3 + $0xf8] sm:$0xff]  ;;  %s4161_s29 = scalar_lea.vmem %s4218_s4, %s2691_s27 }
  0x11   : > { %v230_v9 = vld [vmem:[%s220_s6] sm:$0xff]  ;;  %v231_v10 = vld [vmem:[%s220_s6 + $0x8] sm:$0xff]  ;;  %v233_v11 = vld [vmem:[%s220_s6 + $0x18] sm:$0xff] }
  0x12   : > { %v3333_v14 = vrot.slane %v233_v11, %v236_v7  ;;  %v232_v15 = vld [vmem:[%s220_s6 + $0x10] sm:$0xff]  ;;  %v313_v49 = vld [vmem:[%s4217_s3 + $0xd8] sm:$0xff]  ;;  %v295_v51 = vld [vmem:[%s4217_s3 + $0x48] sm:$0xff] }
  0x13   : > { %v316_v48 = vld [vmem:[%s4217_s3 + $0xf0] sm:$0xff]  ;;  %v294_v52 = vld [vmem:[%s4217_s3 + $0x40] sm:$0xff]  ;;  %v297_v53 = vld [vmem:[%s4217_s3 + $0x58] sm:$0xff] }
  0x14   : > { %v238_v16 = vsub.f32 %v230_v9, %v3333_v14  ;;  %v239_v17 = vsub.f32 %v231_v10, %v3333_v14  ;;  %v240_v18 = vsub.f32 %v232_v15, %v3333_v14  ;;  %v241_v19 = vsub.f32 %v233_v11, %v3333_v14  ;;  %417 = vperm.xlu1 %3023, %v293_v20   ;;  %v312_v50 = vld [vmem:[%s4217_s3 + $0xd0] sm:$0xff]  ;;  %v351_v55 = vld [vmem:[%s4217_s3 + $0x168] sm:$0xff]  ;;  %v350_v56 = vld [vmem:[%s4217_s3 + $0x160] sm:$0xff] }
  0x15   : > { %412 = vperm.xlu0 %3022, %v292_v22   ;;  %v296_v54 = vld [vmem:[%s4217_s3 + $0x50] sm:$0xff]  ;;  %v353_v57 = vld [vmem:[%s4217_s3 + $0x178] sm:$0xff]  ;;  %v355_v59 = vld [vmem:[%s4217_s3 + $0x188] sm:$0xff] }
  0x16   : > { %v378_v21 = vpack.c.bf16 %v239_v17, %v238_v16  ;;  %v379_v23 = vpack.c.bf16 %v241_v19, %v240_v18  ;;  %v352_v58 = vld [vmem:[%s4217_s3 + $0x170] sm:$0xff]  ;;  %v354_v60 = vld [vmem:[%s4217_s3 + $0x180] sm:$0xff]  ;;  %v357_v61 = vld [vmem:[%s4217_s3 + $0x198] sm:$0xff] }
  0x17   : > { %v356_v62 = vld [vmem:[%s4217_s3 + $0x190] sm:$0xff]  ;;  %v359_v63 = vld [vmem:[%s4217_s3 + $0x1a8] sm:$0xff]  ;;  %v358_v0 = vld [vmem:[%s4217_s3 + $0x1a0] sm:$0xff] }
  0x18   : > { %2771 = vmatprep.subr.bf16.mxu0 %v378_v21  ;;  %653 = vperm.xlu1 %3023, %v303_v24   ;;  %v361_v1 = vld [vmem:[%s4217_s3 + $0x1b8] sm:$0xff]  ;;  %v360_v2 = vld [vmem:[%s4217_s3 + $0x1b0] sm:$0xff]  ;;  %v339_v3 = vld [vmem:[%s4217_s3 + $0x108] sm:$0xff] }
  0x19   : > { %2772 = vmatpush3.bf16.msra.mxu0 %v378_v21  ;;  %648 = vperm.xlu0 %3022, %v302_v25   ;;  %v338_v4 = vld [vmem:[%s4217_s3 + $0x100] sm:$0xff]  ;;  %v341_v5 = vld [vmem:[%s4217_s3 + $0x118] sm:$0xff]  ;;  %v340_v6 = vld [vmem:[%s4217_s3 + $0x110] sm:$0xff] }
  0x1a   : > { %2773 = vmatprep.subr.bf16.mxu0 %v379_v23  ;;  %v343_v7 = vld [vmem:[%s4217_s3 + $0x128] sm:$0xff]  ;;  %v342_v8 = vld [vmem:[%s4217_s3 + $0x120] sm:$0xff]  ;;  %v345_v9 = vld [vmem:[%s4217_s3 + $0x138] sm:$0xff] }
  0x1b   : > { %v344_v10 = vld [vmem:[%s4217_s3 + $0x130] sm:$0xff]  ;;  %v347_v11 = vld [vmem:[%s4217_s3 + $0x148] sm:$0xff]  ;;  %v346_v12 = vld [vmem:[%s4217_s3 + $0x140] sm:$0xff] }
  0x1c   : > { %663 = vperm.xlu1 %3023, %v305_v27   ;;  %v349_v13 = vld [vmem:[%s4217_s3 + $0x158] sm:$0xff]  ;;  %v348_v15 = vld [vmem:[%s4217_s3 + $0x150] sm:$0xff]  ;;  %v3521_v16 = vld [vmem:[%s4216_s2] sm:$0xff]  }
  0x1d   : > { %2774 = vmatpush3.bf16.msra.mxu0 %v379_v23  ;;  %658 = vperm.xlu0 %3022, %v304_v29  }
  0x1e   : > { %2795 = vmatprep.mubr.msk.bf16.mxu1 %vm500_vm0, %v3521_v16 }
  0x20   : > { %2776 = vmatmul.mubr.msk.bf16.vlgmr.msra.gmra.mrb[0].mxu0 %vm500_vm0, %v3025_v26  ;;  %673 = vperm.xlu1 %3023, %v307_v30  }
  0x21   : > { %2779 = vmatprep.mubr.msk.bf16.mxu0 %vm500_vm0, %v3026_v28  ;;  %668 = vperm.xlu0 %3022, %v306_v31  }
  0x24   : > { %447 = vperm.xlu1 %3023, %v299_v33  }
  0x25   : > { %442 = vperm.xlu0 %3022, %v298_v34  }
  0x28   : > { %2780 = vmatmul.mubr.msk.bf16.gmra.mrb[4].mxu0 %vm500_vm0, %v3027_v32  ;;  %683 = vperm.xlu1 %3023, %v309_v36  }
  0x29   : > { %2783 = vmatprep.mubr.msk.bf16.mxu0 %vm500_vm0, %v3028_v35  ;;  %678 = vperm.xlu0 %3022, %v308_v37  }
  0x2c   : > { %457 = vperm.xlu1 %3023, %v301_v39  }
  0x2d   : > { %452 = vperm.xlu0 %3022, %v300_v41  }
  0x30   : > { %2784 = vmatmul.mubr.msk.bf16.gmra.mrb[8].mxu0 %vm500_vm0, %v3029_v38  ;;  %325 = vperm.xlu1 %3023, %v315_v42  }
  0x31   : > { %2787 = vmatprep.mubr.msk.bf16.mxu0 %vm500_vm0, %v3030_v40  ;;  %320 = vperm.xlu0 %3022, %v314_v43  }
  0x34   : > { %693 = vperm.xlu1 %3023, %v311_v45  }
  0x35   : > { %688 = vperm.xlu0 %3022, %v310_v46  }
  0x38   : > { %2788 = vmatmul.mubr.msk.bf16.gmra.mrb[12].mxu0 %vm500_vm0, %v3031_v44  ;;  %335 = vperm.xlu1 %3023, %v317_v47  }
  0x39   : > { %330 = vperm.xlu0 %3022, %v316_v48   ;;  %2827 = vmatprep.mubr.msk.bf16.mxu0 %vm500_vm0, %v3521_v16 }
  0x3c   : > { %703 = vperm.xlu1 %3023, %v313_v49  }
  0x3d   : > { %698 = vperm.xlu0 %3022, %v312_v50  }
  0x40   : > { %427 = vperm.xlu1 %3023, %v295_v51  }
  0x41   : > { %422 = vperm.xlu0 %3022, %v294_v52  }
  0x44   : > { %437 = vperm.xlu1 %3023, %v297_v53  }
  0x45   : > { %432 = vperm.xlu0 %3022, %v296_v54  }
  0x48   : > { %1764 = vperm.xlu1 %3023, %v351_v55  }
  0x49   : > { %1759 = vperm.xlu0 %3022, %v350_v56  }
  0x4c   : > { %1774 = vperm.xlu1 %3023, %v353_v57  }
  0x4d   : > { %1769 = vperm.xlu0 %3022, %v352_v58  }
  0x50   : > { %1784 = vperm.xlu1 %3023, %v355_v59  }
  0x51   : > { %1779 = vperm.xlu0 %3022, %v354_v60  }
  0x54   : > { %1794 = vperm.xlu1 %3023, %v357_v61  }
  0x55   : > { %1789 = vperm.xlu0 %3022, %v356_v62  }
  0x58   : > { %1997 = vperm.xlu1 %3023, %v359_v63  }
  0x59   : > { %1992 = vperm.xlu0 %3022, %v358_v0  }
  0x5c   : > { %2007 = vperm.xlu1 %3023, %v361_v1  }
  0x5d   : > { %2002 = vperm.xlu0 %3022, %v360_v2  }
  0x60   : > { %1704 = vperm.xlu1 %3023, %v339_v3  }
  0x61   : > { %1699 = vperm.xlu0 %3022, %v338_v4  }
  0x64   : > { %1714 = vperm.xlu1 %3023, %v341_v5  }
  0x65   : > { %1709 = vperm.xlu0 %3022, %v340_v6  }
  0x68   : > { %1724 = vperm.xlu1 %3023, %v343_v7  }
  0x69   : > { %1719 = vperm.xlu0 %3022, %v342_v8  }
  0x6c   : > { %1734 = vperm.xlu1 %3023, %v345_v9   ;;  %v3570_v9 = vld [vmem:[%s4216_s2 + $0x8] sm:$0xff]  }
  0x6d   : > { %1729 = vperm.xlu0 %3022, %v344_v10  }
  0x70   : > { %1744 = vperm.xlu1 %3023, %v347_v11   ;;  %v3575_v11 = vld [vmem:[%s4216_s2 + $0x10] sm:$0xff]  }
  0x71   : > { %1739 = vperm.xlu0 %3022, %v346_v12  }
  0x74   : > { %1754 = vperm.xlu1 %3023, %v349_v13  }
  0x75   : > { %1749 = vperm.xlu0 %3022, %v348_v15  }
  0x87   : > { %v383_v17 = vpop.permute.xlu0 %382  ;;  %v393_v18 = vpop.permute.xlu1 %392 }
  0x8b   : > { %v388_v19 = vpop.permute.xlu0 %387  ;;  %v398_v20 = vpop.permute.xlu1 %397 }
  0x8f   : > { %v403_v21 = vpop.permute.xlu0 %402  ;;  %v408_v22 = vpop.permute.xlu1 %407 }
  0x93   : > { %v418_v24 = vpop.permute.xlu1 %417 }
  0x94   : > { %v413_v23 = vpop.permute.xlu0 %412 }
  0x97   : > { %v3529_v26 = vpop.permute.xlu1 %653 }
  0x98   : > { %v3527_v25 = vpop.permute.xlu0 %648 }
  0x9b   : > { %v3533_v28 = vpop.permute.xlu1 %663 }
  0x9c   : > { %v3531_v27 = vpop.permute.xlu0 %658 }
  0x9f   : > { %v3537_v30 = vpop.permute.xlu1 %673 }
  0xa0   : > { %v3535_v29 = vpop.permute.xlu0 %668 }
  0xa3   : > { %v3541_v32 = vpop.permute.xlu1 %447 }
  0xa4   : > { %v3539_v31 = vpop.permute.xlu0 %442 }
  0xa7   : > { %v3545_v34 = vpop.permute.xlu1 %683 }
  0xa8   : > { %v3543_v33 = vpop.permute.xlu0 %678 }
  0xab   : > { %v3549_v36 = vpop.permute.xlu1 %457 }
  0xac   : > { %v3547_v35 = vpop.permute.xlu0 %452 }
  0xaf   : > { %v3553_v38 = vpop.permute.xlu1 %325 }
  0xb0   : > { %v3551_v37 = vpop.permute.xlu0 %320 }
  0xb3   : > { %v3557_v40 = vpop.permute.xlu1 %693 }
  0xb4   : > { %v3555_v39 = vpop.permute.xlu0 %688 }
  0xb7   : > { %v3561_v42 = vpop.permute.xlu1 %335 }
  0xb8   : > { %v3559_v41 = vpop.permute.xlu0 %330 }
  0xbb   : > { %v3565_v54 = vpop.permute.xlu1 %703 }
  0xbc   : > { %v3563_v50 = vpop.permute.xlu0 %698 }
  0xbf   : > { %v428_v3 = vpop.permute.xlu1 %427 }
  0xc0   : > { %v423_v62 = vpop.permute.xlu0 %422 }
  0xc4   : > { %v433_v12 = vpop.permute.xlu0 %432 }
  0xf3   : > { %v2777_v43 = vpop.f32.mrb[0].mxu0 }
  0xf4   : > { %v568_v44 = vadd.f32 %v2777_v43, %v393_v18  ;;  %v559_v45 = vpop.f32.mrb[1].mxu0 }
  0xf5   : > { %v560_v46 = vadd.f32 %v559_v45, %v383_v17  ;;  %v2778_v47 = vpop.f32.mrb[2].mxu0 }
  0xf6   : > { %v571_v48 = vadd.f32 %v2778_v47, %v398_v20  ;;  %v562_v49 = vpop.f32.mrb[3].mxu0  ;;  %v624_v52 = vmax.f32 %v568_v44, 0.0  ;;  %v3035_v47 = vld [vmem:[%s4216_s2 + $0x18] sm:$0xff]  }
  0xf7   : > { %v563_v51 = vadd.f32 %v562_v49, %v388_v19  ;;  %v622_v55 = vmax.f32 %v560_v46, 0.0  ;;  %v438_v19 = vpop.permute.xlu1 %437  ;;  %v3036_v49 = vld [vmem:[%s4216_s2 + $0x20] sm:$0xff]  }
  0xf8   : > { %v625_v53 = vmax.f32 %v571_v48, 0.0 }
  0xf9   : > { %v623_v56 = vmax.f32 %v563_v51, 0.0 }
  0xfa   : > { %v639_v57 = vpack.c.bf16 %v625_v53, %v624_v52 }
  0xfb   : > { %v2781_v58 = vpop.f32.mrb[4].mxu0  ;;  %v638_v59 = vpack.c.bf16 %v623_v56, %v622_v55 }
  0xfc   : > { %v584_v60 = vadd.f32 %v2781_v58, %v413_v23  ;;  %v575_v61 = vpop.f32.mrb[5].mxu0 }
  0xfd   : > { %v576_v63 = vadd.f32 %v575_v61, %v403_v21  ;;  %v2782_v0 = vpop.f32.mrb[6].mxu0  ;;  %2791 = vmatprep.subr.bf16.mxu1 %v638_v59 }
  0xfe   : > { %v587_v1 = vadd.f32 %v2782_v0, %v418_v24  ;;  %v578_v2 = vpop.f32.mrb[7].mxu0  ;;  %2792 = vmatpush3.bf16.msra.mxu1 %v638_v59  ;;  %v628_v5 = vmax.f32 %v584_v60, 0.0 }
  0xff   : > { %v579_v4 = vadd.f32 %v578_v2, %v408_v22  ;;  %2793 = vmatprep.subr.bf16.mxu1 %v639_v57  ;;  %v626_v7 = vmax.f32 %v576_v63, 0.0 }
 0x100   : > { %v629_v6 = vmax.f32 %v587_v1, 0.0 }
 0x101   : > { %v627_v8 = vmax.f32 %v579_v4, 0.0 }
 0x102   : > { %v641_v10 = vpack.c.bf16 %v629_v6, %v628_v5  ;;  %2794 = vmatpush3.bf16.msra.mxu1 %v639_v57 }
 0x103   : > { %v640_v13 = vpack.c.bf16 %v627_v8, %v626_v7  ;;  %v2785_v15 = vpop.f32.mrb[8].mxu0 }
 0x104   : > { %v600_v17 = vadd.f32 %v2785_v15, %v433_v12  ;;  %v591_v18 = vpop.f32.mrb[9].mxu0 }
 0x105   : > { %v592_v20 = vadd.f32 %v591_v18, %v423_v62  ;;  %v2786_v21 = vpop.f32.mrb[10].mxu0  ;;  %2796 = vmatmul.mubr.msk.bf16.vlgmr.msra.gmra.mrb[0].mxu1 %vm500_vm0, %v3570_v9  ;;  %2807 = vmatprep.subr.bf16.mxu1 %v640_v13 }
 0x106   : > { %v603_v22 = vadd.f32 %v2786_v21, %v438_v19  ;;  %v594_v23 = vpop.f32.mrb[11].mxu0  ;;  %2808 = vmatpush3.bf16.msra.mxu1 %v640_v13  ;;  %2799 = vmatprep.mubr.msk.bf16.mxu1 %vm500_vm0, %v3575_v11  ;;  %v632_v43 = vmax.f32 %v600_v17, 0.0 }
 0x107   : > { %v595_v24 = vadd.f32 %v594_v23, %v428_v3  ;;  %2809 = vmatprep.subr.bf16.mxu1 %v641_v10  ;;  %v630_v45 = vmax.f32 %v592_v20, 0.0 }
 0x108   : > { %v633_v44 = vmax.f32 %v603_v22, 0.0 }
 0x109   : > { %v631_v46 = vmax.f32 %v595_v24, 0.0 }
 0x10a   : > { %v643_v48 = vpack.c.bf16 %v633_v44, %v632_v43  ;;  %2810 = vmatpush3.bf16.msra.mxu1 %v641_v10 }
 0x10b   : > { %v642_v51 = vpack.c.bf16 %v631_v46, %v630_v45  ;;  %v2789_v52 = vpop.f32.mrb[12].mxu0 }
 0x10c   : > { %v616_v53 = vadd.f32 %v2789_v52, %v3547_v35  ;;  %v607_v55 = vpop.f32.mrb[13].mxu0 }
 0x10d   : > { %v608_v56 = vadd.f32 %v607_v55, %v3539_v31  ;;  %v2790_v57 = vpop.f32.mrb[14].mxu0  ;;  %2800 = vmatmul.mubr.msk.bf16.gmra.mrb[4].mxu1 %vm500_vm0, %v3035_v47  ;;  %2823 = vmatprep.subr.bf16.mxu0 %v642_v51  ;;  %v3037_v31 = vld [vmem:[%s4216_s2 + $0x28] sm:$0xff]  }
 0x10e   : > { %v619_v58 = vadd.f32 %v2790_v57, %v3549_v36  ;;  %v610_v59 = vpop.f32.mrb[15].mxu0  ;;  %2824 = vmatpush3.bf16.msra.mxu0 %v642_v51  ;;  %2803 = vmatprep.mubr.msk.bf16.mxu1 %vm500_vm0, %v3036_v49  ;;  %v636_v61 = vmax.f32 %v616_v53, 0.0 }
 0x10f   : > { %v611_v60 = vadd.f32 %v610_v59, %v3541_v32  ;;  %2825 = vmatprep.subr.bf16.mxu0 %v643_v48  ;;  %v634_v63 = vmax.f32 %v608_v56, 0.0  ;;  %v3625_v32 = vld [vmem:[%s4216_s2 + $0x30] sm:$0xff]  }
 0x110   : > { %v637_v62 = vmax.f32 %v619_v58, 0.0 }
 0x111   : > { %v635_v35 = vmax.f32 %v611_v60, 0.0 }
 0x112   : > { %v645_v0 = vpack.c.bf16 %v637_v62, %v636_v61  ;;  %2826 = vmatpush3.bf16.msra.mxu0 %v643_v48 }
 0x113   : > { %v644_v1 = vpack.c.bf16 %v635_v35, %v634_v63 }
 0x115   : > { %2804 = vmatmul.mubr.msk.bf16.gmra.mrb[8].mxu1 %vm500_vm0, %v3037_v31  ;;  %2828 = vmatmul.mubr.msk.bf16.vlgmr.msra.gmra.mrb[16].mxu0 %vm500_vm0, %v3570_v9 }
 0x116   : > { %2839 = vmatprep.subr.bf16.mxu1 %v644_v1  ;;  %2811 = vmatprep.mubr.msk.bf16.mxu1 %vm500_vm0, %v3521_v16 }
 0x117   : > { %2831 = vmatprep.mubr.msk.bf16.mxu0 %vm500_vm0, %v3575_v11 }
 0x11d   : > { %2812 = vmatmul.mubr.msk.bf16.vlgmr.msra.gmra.mrb[12].mxu1 %vm500_vm0, %v3570_v9  ;;  %2832 = vmatmul.mubr.msk.bf16.gmra.mrb[20].mxu0 %vm500_vm0, %v3035_v47 }
 0x11e   : > { %2840 = vmatpush3.bf16.msra.mxu1 %v644_v1  ;;  %2815 = vmatprep.mubr.msk.bf16.mxu1 %vm500_vm0, %v3575_v11 }
 0x11f   : > { %2841 = vmatprep.subr.bf16.mxu1 %v645_v0  ;;  %2835 = vmatprep.mubr.msk.bf16.mxu0 %vm500_vm0, %v3036_v49 }
 0x122   : > { %2842 = vmatpush3.bf16.msra.mxu1 %v645_v0 }
 0x125   : > { %2816 = vmatmul.mubr.msk.bf16.gmra.mrb[16].mxu1 %vm500_vm0, %v3035_v47  ;;  %2836 = vmatmul.mubr.msk.bf16.gmra.mrb[24].mxu0 %vm500_vm0, %v3037_v31 }
 0x126   : > { %2819 = vmatprep.mubr.msk.bf16.mxu1 %vm500_vm0, %v3036_v49  ;;  %2875 = vmatprep.mubr.msk.bf16.mxu0 %vm500_vm0, %v3625_v32 }
 0x12d   : > { %2820 = vmatmul.mubr.msk.bf16.gmra.mrb[20].mxu1 %vm500_vm0, %v3037_v31 }
 0x12e   : > { %2843 = vmatprep.mubr.msk.bf16.mxu1 %vm500_vm0, %v3521_v16 }
 0x135   : > { %2844 = vmatmul.mubr.msk.bf16.vlgmr.msra.gmra.mrb[24].mxu1 %vm500_vm0, %v3570_v9 }
 0x136   : > { %2847 = vmatprep.mubr.msk.bf16.mxu1 %vm500_vm0, %v3575_v11 }
 0x13d   : > { %2848 = vmatmul.mubr.msk.bf16.gmra.mrb[28].mxu1 %vm500_vm0, %v3035_v47 }
 0x13e   : > { %2851 = vmatprep.mubr.msk.bf16.mxu1 %vm500_vm0, %v3036_v49 }
 0x145   : > { %2852 = vmatmul.mubr.msk.bf16.gmra.mrb[32].mxu1 %vm500_vm0, %v3037_v31 }
 0x146   : > { %2859 = vmatprep.mubr.msk.bf16.mxu1 %vm500_vm0, %v3625_v32 }
 0x1d8   : > { %v2797_v16 = vpop.f32.mrb[0].mxu1 }
 0x1d9   : > { %v797_v36 = vadd.f32 %v2797_v16, %v3531_v27  ;;  %v788_v2 = vpop.f32.mrb[1].mxu1 }
 0x1da   : > { %v789_v3 = vadd.f32 %v788_v2, %v3527_v25  ;;  %v2798_v4 = vpop.f32.mrb[2].mxu1 }
 0x1db   : > { %v2599_v5 = vmul.f32 -1.442695, %v797_v36  ;;  %v800_v6 = vadd.f32 %v2798_v4, %v3533_v28  ;;  %v791_v7 = vpop.f32.mrb[3].mxu1 }
 0x1dc   : > { %v2597_v8 = vmul.f32 -1.442695, %v789_v3  ;;  %v792_v9 = vadd.f32 %v791_v7, %v3529_v26 }
 0x1dd   : > { %3054 = vpow2.f32 %v2599_v5  ;;  %v2600_v10 = vmul.f32 -1.442695, %v800_v6 }
 0x1de   : > { %3056 = vpow2.f32 %v2597_v8  ;;  %v2598_v11 = vmul.f32 -1.442695, %v792_v9 }
 0x1df   : > { %3058 = vpow2.f32 %v2600_v10 }
 0x1e0   : > { %3060 = vpow2.f32 %v2598_v11  ;;  %v2801_v12 = vpop.f32.mrb[4].mxu1 }
 0x1e1   : > { %v813_v13 = vadd.f32 %v2801_v12, %v3543_v33  ;;  %v804_v15 = vpop.f32.mrb[5].mxu1 }
 0x1e2   : > { %v805_v17 = vadd.f32 %v804_v15, %v3535_v29  ;;  %v2802_v18 = vpop.f32.mrb[6].mxu1 }
 0x1e3   : > { %v2603_v19 = vmul.f32 -1.442695, %v813_v13  ;;  %v816_v20 = vadd.f32 %v2802_v18, %v3545_v34  ;;  %v807_v21 = vpop.f32.mrb[7].mxu1 }
 0x1e4   : > { %v2601_v22 = vmul.f32 -1.442695, %v805_v17  ;;  %v808_v23 = vadd.f32 %v807_v21, %v3537_v30 }
 0x1e5   : > { %3062 = vpow2.f32 %v2603_v19  ;;  %v2604_v24 = vmul.f32 -1.442695, %v816_v20 }
 0x1e6   : > { %3064 = vpow2.f32 %v2601_v22  ;;  %v2602_v43 = vmul.f32 -1.442695, %v808_v23 }
 0x1e7   : > { %v3055_v44 = vpop.eup %3054  ;;  %3066 = vpow2.f32 %v2604_v24 }
 0x1e8   : > { %v3057_v45 = vpop.eup %3056  ;;  %v1092_v46 = vadd.f32 1.0, %v3055_v44  ;;  %3068 = vpow2.f32 %v2602_v43  ;;  %v2805_v47 = vpop.f32.mrb[8].mxu1 }
 0x1e9   : > { %v3059_v48 = vpop.eup %3058  ;;  %v1090_v49 = vadd.f32 1.0, %v3057_v45  ;;  %v820_v51 = vpop.f32.mrb[9].mxu1  ;;  %v829_v16 = vadd.f32 %v2805_v47, %v3563_v50 }
 0x1ea   : > { %v3061_v52 = vpop.eup %3060  ;;  %3070 = vrcp.f32 %v1092_v46  ;;  %v1093_v53 = vadd.f32 1.0, %v3059_v48  ;;  %v2806_v55 = vpop.f32.mrb[10].mxu1  ;;  %v821_v3 = vadd.f32 %v820_v51, %v3555_v39 }
 0x1eb   : > { %3072 = vrcp.f32 %v1090_v49  ;;  %v1091_v56 = vadd.f32 1.0, %v3061_v52  ;;  %v823_v57 = vpop.f32.mrb[11].mxu1  ;;  %v832_v7 = vadd.f32 %v2806_v55, %v3565_v54 }
 0x1ec   : > { %3074 = vrcp.f32 %v1093_v53  ;;  %v824_v10 = vadd.f32 %v823_v57, %v3557_v40 }
 0x1ed   : > { %3076 = vrcp.f32 %v1091_v56 }
 0x1ef   : > { %v3063_v58 = vpop.eup %3062 }
 0x1f0   : > { %v3065_v59 = vpop.eup %3064  ;;  %v1116_v61 = vadd.f32 1.0, %v3063_v58 }
 0x1f1   : > { %v3067_v60 = vpop.eup %3066  ;;  %v1114_v63 = vadd.f32 1.0, %v3065_v59 }
 0x1f2   : > { %v3069_v62 = vpop.eup %3068  ;;  %v1117_v35 = vadd.f32 1.0, %v3067_v60  ;;  %3078 = vrcp.f32 %v1116_v61 }
 0x1f3   : > { %v1115_v0 = vadd.f32 1.0, %v3069_v62  ;;  %3080 = vrcp.f32 %v1114_v63  ;;  %v3678_v62 = vld [vmem:[%s4216_s2 + $0x38] sm:$0xff]   ;;  %v3683_v63 = vld [vmem:[%s4216_s2 + $0x40] sm:$0xff]  }
 0x1f4   : > { %v3071_v31 = vpop.eup %3070  ;;  %3082 = vrcp.f32 %v1117_v35 }
 0x1f5   : > { %v3073_v1 = vpop.eup %3072  ;;  %v1128_v36 = vmul.f32 %v3071_v31, %v3559_v41  ;;  %3084 = vrcp.f32 %v1115_v0  ;;  %v3696_v0 = vld [vmem:[%s4216_s2 + $0x48] sm:$0xff]  }
 0x1f6   : > { %v3075_v2 = vpop.eup %3074  ;;  %v1126_v4 = vmul.f32 %v3073_v1, %v3551_v37 }
 0x1f7   : > { %v3077_v5 = vpop.eup %3076  ;;  %v1132_v6 = vadd.f32 %v1128_v36, %v829_v16  ;;  %v1129_v8 = vmul.f32 %v3075_v2, %v3561_v42  ;;  %v3703_v16 = vld [vmem:[%s4216_s2 + $0x50] sm:$0xff]   ;;  %v3714_v2 = vld [vmem:[%s4216_s2 + $0x58] sm:$0xff]  }
 0x1f8   : > { %v1130_v9 = vadd.f32 %v1126_v4, %v821_v3  ;;  %v1127_v11 = vmul.f32 %v3077_v5, %v3553_v38  ;;  %v3647_v12 = vpop.f32.mrb[24].mxu0 }
 0x1f9   : > { %3086 = vtanh.f32 %v1132_v6  ;;  %v1133_v13 = vadd.f32 %v1129_v8, %v832_v7  ;;  %v3649_v15 = vpop.f32.mrb[25].mxu0 }
 0x1fa   : > { %3088 = vtanh.f32 %v1130_v9  ;;  %v1131_v17 = vadd.f32 %v1127_v11, %v824_v10  ;;  %v3651_v18 = vpop.f32.mrb[26].mxu0 }
 0x1fb   : > { %3090 = vtanh.f32 %v1133_v13  ;;  %v3653_v19 = vpop.f32.mrb[27].mxu0 }
 0x1fc   : > { %3092 = vtanh.f32 %v1131_v17  ;;  %v3079_v20 = vpop.eup %3078 }
 0x1fd   : > { %v3081_v21 = vpop.eup %3080 }
 0x1fe   : > { %v3083_v23 = vpop.eup %3082 }
 0x1ff   : > { %v3085_v43 = vpop.eup %3084 }
 0x200   : > { %v3655_v22 = vpop.f32.mrb[20].mxu1 }
 0x201   : > { %v3657_v24 = vpop.f32.mrb[21].mxu1 }
 0x202   : > { %v3659_v44 = vpop.f32.mrb[22].mxu1 }
 0x203   : > { %v3087_v45 = vpop.eup %3086  ;;  %v3661_v46 = vpop.f32.mrb[23].mxu1 }
 0x204   : > { %v3089_v47 = vpop.eup %3088  ;;  %v1140_v48 = vmul.f32 %v3087_v45, %v3079_v20 }
 0x205   : > { %v3091_v49 = vpop.eup %3090  ;;  %v1138_v51 = vmul.f32 %v3089_v47, %v3081_v21 }
 0x206   : > { %v3093_v52 = vpop.eup %3092  ;;  %v1141_v53 = vmul.f32 %v3091_v49, %v3083_v23  ;;  %v3663_v55 = vsub.f32 %v3087_v45, %v1140_v48 }
 0x207   : > { %v1139_v56 = vmul.f32 %v3093_v52, %v3085_v43  ;;  %v3665_v57 = vsub.f32 %v3089_v47, %v1138_v51 }
 0x208   : > { %v3667_v58 = vsub.f32 %v3091_v49, %v1141_v53 }
 0x209   : > { %v3669_v59 = vsub.f32 %v3093_v52, %v1139_v56 }
 0x20a   : > { %v1147_v61 = vpack.c.bf16 %v3667_v58, %v3663_v55 }
 0x20b   : > { %v1146_v60 = vpack.c.bf16 %v3669_v59, %v3665_v57 }
 0x20d   : > { %2855 = vmatprep.subr.bf16.mxu1 %v1146_v60 }
 0x20e   : > { %2856 = vmatpush3.bf16.msra.mxu1 %v1146_v60 }
 0x20f   : > { %2857 = vmatprep.subr.bf16.mxu1 %v1147_v61 }
 0x212   : > { %2858 = vmatpush3.bf16.msra.mxu1 %v1147_v61 }
 0x215   : > { %2860 = vmatmul.mubr.msk.bf16.vlgmr.msra.gmra.mrb[12].mxu1 %vm500_vm0, %v3678_v62 }
 0x216   : > { %2863 = vmatprep.mubr.msk.bf16.mxu1 %vm500_vm0, %v3683_v63 }
 0x218   : > { %v3689_v35 = vpop.f32.mrb[32].mxu1 }
 0x219   : > { %v3691_v31 = vpop.f32.mrb[33].mxu1 }
 0x21a   : > { %v3698_v1 = vpop.f32.mrb[34].mxu1 }
 0x21b   : > { %v3705_v36 = vpop.f32.mrb[35].mxu1 }
 0x21d   : > { %2864 = vmatmul.mubr.msk.bf16.gmra.mrb[16].mxu1 %vm500_vm0, %v3696_v0 }
 0x21e   : > { %2867 = vmatprep.mubr.msk.bf16.mxu1 %vm500_vm0, %v3703_v16 }
 0x225   : > { %2868 = vmatmul.mubr.msk.bf16.gmra.mrb[36].mxu1 %vm500_vm0, %v3714_v2 }
 0x226   : > { %2891 = vmatprep.mubr.msk.bf16.mxu1 %vm500_vm0, %v3625_v32 }
 0x2e8   : > { %v2861_v3 = vpop.f32.mrb[12].mxu1 }
 0x2e9   : > { %v2927_v4 = vadd.f32 %v2861_v3, %v3531_v27  ;;  %v1230_v5 = vpop.f32.mrb[13].mxu1 }
 0x2ea   : > { %v2928_v6 = vadd.f32 %v1230_v5, %v3527_v25  ;;  %v2862_v7 = vpop.f32.mrb[14].mxu1 }
 0x2eb   : > { %v2619_v8 = vmul.f32 -1.442695, %v2927_v4  ;;  %v2929_v9 = vadd.f32 %v2862_v7, %v3533_v28  ;;  %v1233_v10 = vpop.f32.mrb[15].mxu1 }
 0x2ec   : > { %v2617_v11 = vmul.f32 -1.442695, %v2928_v6  ;;  %v2930_v13 = vadd.f32 %v1233_v10, %v3529_v26 }
 0x2ed   : > { %3094 = vpow2.f32 %v2619_v8  ;;  %v2620_v17 = vmul.f32 -1.442695, %v2929_v9 }
 0x2ee   : > { %3096 = vpow2.f32 %v2617_v11  ;;  %v2618_v20 = vmul.f32 -1.442695, %v2930_v13 }
 0x2ef   : > { %3098 = vpow2.f32 %v2620_v17 }
 0x2f0   : > { %3100 = vpow2.f32 %v2618_v20  ;;  %v2865_v32 = vpop.f32.mrb[16].mxu1 }
 0x2f1   : > { %v2931_v21 = vadd.f32 %v2865_v32, %v3543_v33  ;;  %v1246_v23 = vpop.f32.mrb[17].mxu1 }
 0x2f2   : > { %v2932_v43 = vadd.f32 %v1246_v23, %v3535_v29  ;;  %v2866_v45 = vpop.f32.mrb[18].mxu1 }
 0x2f3   : > { %v2623_v47 = vmul.f32 -1.442695, %v2931_v21  ;;  %v2933_v48 = vadd.f32 %v2866_v45, %v3545_v34  ;;  %v1249_v49 = vpop.f32.mrb[19].mxu1 }
 0x2f4   : > { %v2621_v51 = vmul.f32 -1.442695, %v2932_v43  ;;  %v2934_v52 = vadd.f32 %v1249_v49, %v3537_v30 }
 0x2f5   : > { %v2624_v53 = vmul.f32 -1.442695, %v2933_v48  ;;  %3102 = vpow2.f32 %v2623_v47 }
 0x2f6   : > { %v2622_v56 = vmul.f32 -1.442695, %v2934_v52  ;;  %3104 = vpow2.f32 %v2621_v51  ;;  %v910_v51 = vadd.f32 %v3655_v22, %v3563_v50  ;;  %v905_v22 = vadd.f32 %v3661_v46, %v3557_v40 }
 0x2f7   : > { %v3095_v60 = vpop.eup %3094  ;;  %3106 = vpow2.f32 %v2624_v53 }
 0x2f8   : > { %v3097_v61 = vpop.eup %3096  ;;  %v1295_v3 = vadd.f32 1.0, %v3095_v60  ;;  %v2869_v4 = vpop.f32.mrb[36].mxu1  ;;  %3108 = vpow2.f32 %v2622_v56  ;;  %v902_v60 = vadd.f32 %v3657_v24, %v3555_v39 }
 0x2f9   : > { %v3099_v5 = vpop.eup %3098  ;;  %v1293_v6 = vadd.f32 1.0, %v3097_v61  ;;  %v1262_v7 = vpop.f32.mrb[37].mxu1  ;;  %v1335_v43 = vadd.f32 %v2869_v4, %v3559_v41  ;;  %v913_v4 = vadd.f32 %v3659_v44, %v3565_v54 }
 0x2fa   : > { %v3101_v8 = vpop.eup %3100  ;;  %3110 = vrcp.f32 %v1295_v3  ;;  %v1296_v9 = vadd.f32 1.0, %v3099_v5  ;;  %v2870_v10 = vpop.f32.mrb[38].mxu1  ;;  %v1333_v48 = vadd.f32 %v1262_v7, %v3551_v37 }
 0x2fb   : > { %3112 = vrcp.f32 %v1293_v6  ;;  %v1294_v11 = vadd.f32 1.0, %v3101_v8  ;;  %v1265_v13 = vpop.f32.mrb[39].mxu1  ;;  %v1336_v53 = vadd.f32 %v2870_v10, %v3561_v42 }
 0x2fc   : > { %3114 = vrcp.f32 %v1296_v9  ;;  %v1334_v3 = vadd.f32 %v1265_v13, %v3553_v38 }
 0x2fd   : > { %3116 = vrcp.f32 %v1294_v11 }
 0x2ff   : > { %v3103_v17 = vpop.eup %3102 }
 0x300   : > { %v3105_v20 = vpop.eup %3104  ;;  %v1323_v23 = vadd.f32 1.0, %v3103_v17 }
 0x301   : > { %v3107_v32 = vpop.eup %3106  ;;  %v1321_v47 = vadd.f32 1.0, %v3105_v20 }
 0x302   : > { %v3109_v21 = vpop.eup %3108  ;;  %3118 = vrcp.f32 %v1323_v23  ;;  %v1324_v10 = vadd.f32 1.0, %v3107_v32 }
 0x303   : > { %3120 = vrcp.f32 %v1321_v47  ;;  %v1322_v24 = vadd.f32 1.0, %v3109_v21 }
 0x304   : > { %v3111_v45 = vpop.eup %3110 }
 0x305   : > { %v3113_v49 = vpop.eup %3112  ;;  %v1339_v52 = vmul.f32 %v3111_v45, %v1335_v43 }
 0x306   : > { %v3115_v56 = vpop.eup %3114  ;;  %v1337_v61 = vmul.f32 %v3113_v49, %v1333_v48 }
 0x307   : > { %v3117_v5 = vpop.eup %3116  ;;  %v1343_v6 = vadd.f32 %v1339_v52, %v910_v51  ;;  %v1340_v7 = vmul.f32 %v3115_v56, %v1336_v53 }
 0x308   : > { %v1341_v8 = vadd.f32 %v1337_v61, %v902_v60  ;;  %v1338_v9 = vmul.f32 %v3117_v5, %v1334_v3 }
 0x309   : > { %3122 = vtanh.f32 %v1343_v6  ;;  %v1344_v11 = vadd.f32 %v1340_v7, %v913_v4 }
 0x30a   : > { %3124 = vtanh.f32 %v1341_v8  ;;  %v1342_v17 = vadd.f32 %v1338_v9, %v905_v22 }
 0x30b   : > { %3126 = vtanh.f32 %v1344_v11 }
 0x30c   : > { %3128 = vtanh.f32 %v1342_v17  ;;  %v3119_v44 = vpop.eup %3118 }
 0x30d   : > { %3130 = vrcp.f32 %v1324_v10  ;;  %v3121_v13 = vpop.eup %3120 }
 0x30e   : > { %3132 = vrcp.f32 %v1322_v24 }
 0x313   : > { %v3123_v20 = vpop.eup %3122 }
 0x314   : > { %v3125_v23 = vpop.eup %3124  ;;  %v1351_v43 = vsub.f32 %v3663_v55, %v3123_v20 }
 0x315   : > { %v3127_v46 = vpop.eup %3126  ;;  %v1349_v45 = vsub.f32 %v3665_v57, %v3125_v23 }
 0x316   : > { %v3129_v47 = vpop.eup %3128  ;;  %v1352_v32 = vsub.f32 %v3667_v58, %v3127_v46  ;;  %v1355_v48 = vmul.f32 %v3119_v44, %v1351_v43 }
 0x317   : > { %v3131_v21 = vpop.eup %3130  ;;  %v1350_v49 = vsub.f32 %v3669_v59, %v3129_v47  ;;  %v1353_v51 = vmul.f32 %v3121_v13, %v1349_v45 }
 0x318   : > { %v3133_v52 = vpop.eup %3132  ;;  %v1356_v53 = vmul.f32 %v3131_v21, %v1352_v32  ;;  %v3744_v56 = vadd.f32 %v3123_v20, %v1355_v48 }
 0x319   : > { %v1354_v60 = vmul.f32 %v3133_v52, %v1350_v49  ;;  %v3746_v61 = vadd.f32 %v3125_v23, %v1353_v51 }
 0x31a   : > { %v3748_v3 = vadd.f32 %v3127_v46, %v1356_v53 }
 0x31b   : > { %v3750_v55 = vadd.f32 %v3129_v47, %v1354_v60 }
 0x31c   : > { %v1362_v58 = vpack.c.bf16 %v3748_v3, %v3744_v56 }
 0x31d   : > { %v1361_v57 = vpack.c.bf16 %v3750_v55, %v3746_v61 }
 0x31f   : > { %2871 = vmatprep.subr.bf16.mxu0 %v1361_v57 }
 0x320   : > { %2872 = vmatpush3.bf16.msra.mxu0 %v1361_v57 }
 0x321   : > { %2873 = vmatprep.subr.bf16.mxu0 %v1362_v58 }
 0x324   : > { %2874 = vmatpush3.bf16.msra.mxu0 %v1362_v58 }
 0x327   : > { %2876 = vmatmul.mubr.msk.bf16.vlgmr.msra.gmra.mrb[16].mxu0 %vm500_vm0, %v3678_v62 }
 0x328   : > { %2879 = vmatprep.mubr.msk.bf16.mxu0 %vm500_vm0, %v3683_v63 }
 0x32f   : > { %2880 = vmatmul.mubr.msk.bf16.gmra.mrb[20].mxu0 %vm500_vm0, %v3696_v0 }
 0x330   : > { %2883 = vmatprep.mubr.msk.bf16.mxu0 %vm500_vm0, %v3703_v16 }
 0x337   : > { %2884 = vmatmul.mubr.msk.bf16.gmra.mrb[28].mxu0 %vm500_vm0, %v3714_v2 }
 0x3fa   : > { %v2877_v59 = vpop.f32.mrb[16].mxu0 }
 0x3fb   : > { %v2935_v5 = vadd.f32 %v2877_v59, %v3531_v27  ;;  %v1397_v4 = vpop.f32.mrb[17].mxu0 }
 0x3fc   : > { %v2936_v6 = vadd.f32 %v1397_v4, %v3527_v25  ;;  %v2878_v7 = vpop.f32.mrb[18].mxu0 }
 0x3fd   : > { %v2633_v22 = vmul.f32 -1.442695, %v2935_v5  ;;  %v2937_v8 = vadd.f32 %v2878_v7, %v3533_v28  ;;  %v1400_v9 = vpop.f32.mrb[19].mxu0 }
 0x3fe   : > { %v2631_v10 = vmul.f32 -1.442695, %v2936_v6  ;;  %v2938_v11 = vadd.f32 %v1400_v9, %v3529_v26 }
 0x3ff   : > { %3134 = vpow2.f32 %v2633_v22  ;;  %v2634_v24 = vmul.f32 -1.442695, %v2937_v8 }
 0x400   : > { %3136 = vpow2.f32 %v2631_v10  ;;  %v2632_v17 = vmul.f32 -1.442695, %v2938_v11 }
 0x401   : > { %3138 = vpow2.f32 %v2634_v24 }
 0x402   : > { %3140 = vpow2.f32 %v2632_v17  ;;  %v2881_v44 = vpop.f32.mrb[20].mxu0 }
 0x403   : > { %v2939_v13 = vadd.f32 %v2881_v44, %v3543_v33  ;;  %v1413_v20 = vpop.f32.mrb[21].mxu0 }
 0x404   : > { %v2940_v23 = vadd.f32 %v1413_v20, %v3535_v29  ;;  %v2882_v43 = vpop.f32.mrb[22].mxu0 }
 0x405   : > { %v2637_v46 = vmul.f32 -1.442695, %v2939_v13  ;;  %v2941_v45 = vadd.f32 %v2882_v43, %v3545_v34  ;;  %v1416_v47 = vpop.f32.mrb[23].mxu0  ;;  %v991_v43 = vadd.f32 %v3647_v12, %v3563_v50  ;;  %v986_v12 = vadd.f32 %v3653_v19, %v3557_v40 }
 0x406   : > { %v2635_v32 = vmul.f32 -1.442695, %v2940_v23  ;;  %v2942_v48 = vadd.f32 %v1416_v47, %v3537_v30 }
 0x407   : > { %v2638_v21 = vmul.f32 -1.442695, %v2941_v45  ;;  %3142 = vpow2.f32 %v2637_v46 }
 0x408   : > { %v2636_v49 = vmul.f32 -1.442695, %v2942_v48  ;;  %3144 = vpow2.f32 %v2635_v32  ;;  %v983_v32 = vadd.f32 %v3649_v15, %v3555_v39 }
 0x409   : > { %v3135_v51 = vpop.eup %3134  ;;  %3146 = vpow2.f32 %v2638_v21 }
 0x40a   : > { %v3137_v52 = vpop.eup %3136  ;;  %v1462_v53 = vadd.f32 1.0, %v3135_v51  ;;  %v2885_v60 = vpop.f32.mrb[28].mxu0  ;;  %3148 = vpow2.f32 %v2636_v49  ;;  %v994_v51 = vadd.f32 %v3651_v18, %v3565_v54 }
 0x40b   : > { %v3139_v57 = vpop.eup %3138  ;;  %v1460_v58 = vadd.f32 1.0, %v3137_v52  ;;  %v1429_v59 = vpop.f32.mrb[29].mxu0  ;;  %v1502_v17 = vadd.f32 %v2885_v60, %v3559_v41 }
 0x40c   : > { %v3141_v5 = vpop.eup %3140  ;;  %3150 = vrcp.f32 %v1462_v53  ;;  %v1463_v4 = vadd.f32 1.0, %v3139_v57  ;;  %v2886_v6 = vpop.f32.mrb[30].mxu0  ;;  %v1500_v20 = vadd.f32 %v1429_v59, %v3551_v37 }
 0x40d   : > { %3152 = vrcp.f32 %v1460_v58  ;;  %v1461_v7 = vadd.f32 1.0, %v3141_v5  ;;  %v1432_v22 = vpop.f32.mrb[31].mxu0  ;;  %v1503_v45 = vadd.f32 %v2886_v6, %v3561_v42 }
 0x40e   : > { %3154 = vrcp.f32 %v1463_v4  ;;  %v1501_v21 = vadd.f32 %v1432_v22, %v3553_v38 }
 0x40f   : > { %3156 = vrcp.f32 %v1461_v7 }
 0x411   : > { %v3143_v8 = vpop.eup %3142 }
 0x412   : > { %v3145_v9 = vpop.eup %3144  ;;  %v1490_v24 = vadd.f32 1.0, %v3143_v8 }
 0x413   : > { %v3147_v10 = vpop.eup %3146  ;;  %v1488_v13 = vadd.f32 1.0, %v3145_v9 }
 0x414   : > { %v3149_v11 = vpop.eup %3148  ;;  %3158 = vrcp.f32 %v1490_v24  ;;  %v1491_v58 = vadd.f32 1.0, %v3147_v10 }
 0x415   : > { %3160 = vrcp.f32 %v1488_v13  ;;  %v1489_v15 = vadd.f32 1.0, %v3149_v11 }
 0x416   : > { %v3151_v44 = vpop.eup %3150 }
 0x417   : > { %v3153_v23 = vpop.eup %3152  ;;  %v1506_v46 = vmul.f32 %v3151_v44, %v1502_v17 }
 0x418   : > { %v3155_v47 = vpop.eup %3154  ;;  %v1504_v48 = vmul.f32 %v3153_v23, %v1500_v20 }
 0x419   : > { %v3157_v49 = vpop.eup %3156  ;;  %v1510_v52 = vadd.f32 %v1506_v46, %v991_v43  ;;  %v1507_v53 = vmul.f32 %v3155_v47, %v1503_v45 }
 0x41a   : > { %v1508_v60 = vadd.f32 %v1504_v48, %v983_v32  ;;  %v1505_v57 = vmul.f32 %v3157_v49, %v1501_v21 }
 0x41b   : > { %3162 = vtanh.f32 %v1510_v52  ;;  %v1511_v59 = vadd.f32 %v1507_v53, %v994_v51 }
 0x41c   : > { %3164 = vtanh.f32 %v1508_v60  ;;  %v1509_v5 = vadd.f32 %v1505_v57, %v986_v12 }
 0x41d   : > { %3166 = vtanh.f32 %v1511_v59 }
 0x41e   : > { %3168 = vtanh.f32 %v1509_v5  ;;  %v3159_v18 = vpop.eup %3158 }
 0x41f   : > { %3170 = vrcp.f32 %v1491_v58  ;;  %v3161_v4 = vpop.eup %3160 }
 0x420   : > { %3172 = vrcp.f32 %v1489_v15 }
 0x425   : > { %v3163_v6 = vpop.eup %3162 }
 0x426   : > { %v3165_v7 = vpop.eup %3164  ;;  %v1518_v22 = vsub.f32 %v3744_v56, %v3163_v6 }
 0x427   : > { %v3167_v19 = vpop.eup %3166  ;;  %v1516_v8 = vsub.f32 %v3746_v61, %v3165_v7 }
 0x428   : > { %v3169_v9 = vpop.eup %3168  ;;  %v1519_v10 = vsub.f32 %v3748_v3, %v3167_v19  ;;  %v1522_v24 = vmul.f32 %v3159_v18, %v1518_v22 }
 0x429   : > { %v3171_v11 = vpop.eup %3170  ;;  %v1517_v17 = vsub.f32 %v3750_v55, %v3169_v9  ;;  %v1520_v44 = vmul.f32 %v3161_v4, %v1516_v8  ;;  %v3044_v55 = vld [vmem:[%s4216_s2 + $0x60] sm:$0xff]  }
 0x42a   : > { %v3173_v13 = vpop.eup %3172  ;;  %v1523_v20 = vmul.f32 %v3171_v11, %v1519_v10  ;;  %v3790_v23 = vadd.f32 %v3163_v6, %v1522_v24  ;;  %2907 = vmatprep.mubr.msk.bf16.mxu0 %vm500_vm0, %v3044_v55  ;;  %v1072_v55 = vadd.f32 %v3689_v35, %v3563_v50  ;;  %v1067_v50 = vadd.f32 %v3705_v36, %v3557_v40 }
 0x42b   : > { %v1521_v43 = vmul.f32 %v3173_v13, %v1517_v17  ;;  %v3792_v46 = vadd.f32 %v3165_v7, %v1520_v44 }
 0x42c   : > { %v3794_v45 = vadd.f32 %v3167_v19, %v1523_v20 }
 0x42d   : > { %v3796_v56 = vadd.f32 %v3169_v9, %v1521_v43 }
 0x42e   : > { %v1529_v3 = vpack.c.bf16 %v3794_v45, %v3790_v23 }
 0x42f   : > { %v1528_v61 = vpack.c.bf16 %v3796_v56, %v3792_v46 }
 0x431   : > { %2887 = vmatprep.subr.bf16.mxu1 %v1528_v61 }
 0x432   : > { %2888 = vmatpush3.bf16.msra.mxu1 %v1528_v61 }
 0x433   : > { %2889 = vmatprep.subr.bf16.mxu1 %v1529_v3 }
 0x436   : > { %2890 = vmatpush3.bf16.msra.mxu1 %v1529_v3 }
 0x439   : > { %2892 = vmatmul.mubr.msk.bf16.vlgmr.msra.gmra.mrb[24].mxu1 %vm500_vm0, %v3678_v62 }
 0x43a   : > { %2895 = vmatprep.mubr.msk.bf16.mxu1 %vm500_vm0, %v3683_v63 }
 0x441   : > { %2896 = vmatmul.mubr.msk.bf16.gmra.mrb[28].mxu1 %vm500_vm0, %v3696_v0 }
 0x442   : > { %2899 = vmatprep.mubr.msk.bf16.mxu1 %vm500_vm0, %v3703_v16 }
 0x449   : > { %2900 = vmatmul.mubr.msk.bf16.gmra.mrb[40].mxu1 %vm500_vm0, %v3714_v2 }
 0x50c   : > { %v2893_v47 = vpop.f32.mrb[24].mxu1 }
 0x50d   : > { %v2943_v62 = vadd.f32 %v2893_v47, %v3531_v27  ;;  %v1564_v32 = vpop.f32.mrb[25].mxu1 }
 0x50e   : > { %v2944_v63 = vadd.f32 %v1564_v32, %v3527_v25  ;;  %v2894_v48 = vpop.f32.mrb[26].mxu1 }
 0x50f   : > { %v2647_v0 = vmul.f32 -1.442695, %v2943_v62  ;;  %v2945_v21 = vadd.f32 %v2894_v48, %v3533_v28  ;;  %v1567_v16 = vpop.f32.mrb[27].mxu1 }
 0x510   : > { %v2645_v49 = vmul.f32 -1.442695, %v2944_v63  ;;  %v2946_v2 = vadd.f32 %v1567_v16, %v3529_v26  ;;  %v1064_v63 = vadd.f32 %v3691_v31, %v3555_v39 }
 0x511   : > { %3174 = vpow2.f32 %v2647_v0  ;;  %v2648_v51 = vmul.f32 -1.442695, %v2945_v21 }
 0x512   : > { %3176 = vpow2.f32 %v2645_v49  ;;  %v2646_v52 = vmul.f32 -1.442695, %v2946_v2 }
 0x513   : > { %3178 = vpow2.f32 %v2648_v51 }
 0x514   : > { %3180 = vpow2.f32 %v2646_v52  ;;  %v2897_v53 = vpop.f32.mrb[28].mxu1 }
 0x515   : > { %v2947_v27 = vadd.f32 %v2897_v53, %v3543_v33  ;;  %v1580_v12 = vpop.f32.mrb[29].mxu1 }
 0x516   : > { %v2948_v25 = vadd.f32 %v1580_v12, %v3535_v29  ;;  %v2898_v60 = vpop.f32.mrb[30].mxu1 }
 0x517   : > { %v2651_v57 = vmul.f32 -1.442695, %v2947_v27  ;;  %v2949_v28 = vadd.f32 %v2898_v60, %v3545_v34  ;;  %v1583_v58 = vpop.f32.mrb[31].mxu1 }
 0x518   : > { %v2649_v59 = vmul.f32 -1.442695, %v2948_v25  ;;  %v2950_v26 = vadd.f32 %v1583_v58, %v3537_v30 }
 0x519   : > { %v2652_v15 = vmul.f32 -1.442695, %v2949_v28  ;;  %3182 = vpow2.f32 %v2651_v57 }
 0x51a   : > { %v2650_v5 = vmul.f32 -1.442695, %v2950_v26  ;;  %3184 = vpow2.f32 %v2649_v59 }
 0x51b   : > { %v3175_v18 = vpop.eup %3174  ;;  %3186 = vpow2.f32 %v2652_v15 }
 0x51c   : > { %v3177_v4 = vpop.eup %3176  ;;  %v1629_v6 = vadd.f32 1.0, %v3175_v18  ;;  %v2901_v33 = vpop.f32.mrb[40].mxu1  ;;  %3188 = vpow2.f32 %v2650_v5 }
 0x51d   : > { %v3179_v7 = vpop.eup %3178  ;;  %v1627_v22 = vadd.f32 1.0, %v3177_v4  ;;  %v1596_v29 = vpop.f32.mrb[41].mxu1  ;;  %v1669_v13 = vadd.f32 %v2901_v33, %v3559_v41  ;;  %v1075_v41 = vadd.f32 %v3698_v1, %v3565_v54  ;;  %v3049_v33 = vld [vmem:[%s4216_s2 + $0x88] sm:$0xff]  }
 0x51e   : > { %v3181_v19 = vpop.eup %3180  ;;  %3190 = vrcp.f32 %v1629_v6  ;;  %v1630_v34 = vadd.f32 1.0, %v3179_v7  ;;  %v2902_v8 = vpop.f32.mrb[42].mxu1  ;;  %v1667_v61 = vadd.f32 %v1596_v29, %v3551_v37  ;;  %v3048_v6 = vld [vmem:[%s4216_s2 + $0x80] sm:$0xff]   ;;  %v3050_v7 = vld [vmem:[%s4216_s2 + $0x90] sm:$0xff]  }
 0x51f   : > { %3192 = vrcp.f32 %v1627_v22  ;;  %v1628_v9 = vadd.f32 1.0, %v3181_v19  ;;  %v1599_v30 = vpop.f32.mrb[43].mxu1  ;;  %v1670_v62 = vadd.f32 %v2902_v8, %v3561_v42  ;;  %v3051_v22 = vld [vmem:[%s4216_s2 + $0x98] sm:$0xff]   ;;  %v3052_v29 = vld [vmem:[%s4216_s2 + $0xa0] sm:$0xff]   ;;  %v3053_v19 = vld [vmem:[%s4216_s2 + $0xa8] sm:$0xff]   ;;  %v1765_v8 = vpop.permute.xlu1 %1764 }
 0x520   : > { %3194 = vrcp.f32 %v1630_v34  ;;  %v1668_v0 = vadd.f32 %v1599_v30, %v3553_v38  ;;  %v1760_v34 = vpop.permute.xlu0 %1759 }
 0x521   : > { %3196 = vrcp.f32 %v1628_v9 }
 0x523   : > { %v3183_v10 = vpop.eup %3182  ;;  %v1775_v30 = vpop.permute.xlu1 %1774 }
 0x524   : > { %v3185_v24 = vpop.eup %3184  ;;  %v1657_v44 = vadd.f32 1.0, %v3183_v10  ;;  %v1770_v9 = vpop.permute.xlu0 %1769 }
 0x525   : > { %v3187_v11 = vpop.eup %3186  ;;  %v1655_v43 = vadd.f32 1.0, %v3185_v24 }
 0x526   : > { %v3189_v17 = vpop.eup %3188  ;;  %3198 = vrcp.f32 %v1657_v44  ;;  %v1658_v49 = vadd.f32 1.0, %v3187_v11 }
 0x527   : > { %3200 = vrcp.f32 %v1655_v43  ;;  %v1656_v39 = vadd.f32 1.0, %v3189_v17  ;;  %v1785_v24 = vpop.permute.xlu1 %1784 }
 0x528   : > { %v3191_v20 = vpop.eup %3190  ;;  %v1780_v10 = vpop.permute.xlu0 %1779 }
 0x529   : > { %v3193_v3 = vpop.eup %3192  ;;  %v1673_v47 = vmul.f32 %v3191_v20, %v1669_v13 }
 0x52a   : > { %v3195_v32 = vpop.eup %3194  ;;  %v1671_v48 = vmul.f32 %v3193_v3, %v1667_v61 }
 0x52b   : > { %v3197_v21 = vpop.eup %3196  ;;  %v1677_v37 = vadd.f32 %v1673_v47, %v1072_v55  ;;  %v1674_v16 = vmul.f32 %v3195_v32, %v1670_v62  ;;  %v1795_v17 = vpop.permute.xlu1 %1794 }
 0x52c   : > { %v1675_v35 = vadd.f32 %v1671_v48, %v1064_v63  ;;  %v1672_v42 = vmul.f32 %v3197_v21, %v1668_v0  ;;  %v1790_v11 = vpop.permute.xlu0 %1789 }
 0x52d   : > { %3202 = vtanh.f32 %v1677_v37  ;;  %v1678_v2 = vadd.f32 %v1674_v16, %v1075_v41 }
 0x52e   : > { %3204 = vtanh.f32 %v1675_v35  ;;  %v1676_v31 = vadd.f32 %v1672_v42, %v1067_v50 }
 0x52f   : > { %3206 = vtanh.f32 %v1678_v2  ;;  %v1998_v13 = vpop.permute.xlu1 %1997 }
 0x530   : > { %3208 = vtanh.f32 %v1676_v31  ;;  %v3199_v38 = vpop.eup %3198  ;;  %v1993_v44 = vpop.permute.xlu0 %1992 }
 0x531   : > { %3210 = vrcp.f32 %v1658_v49  ;;  %v3201_v54 = vpop.eup %3200 }
 0x532   : > { %3212 = vrcp.f32 %v1656_v39 }
 0x533   : > { %v2008_v43 = vpop.permute.xlu1 %2007 }
 0x534   : > { %v2003_v20 = vpop.permute.xlu0 %2002 }
 0x537   : > { %v3203_v1 = vpop.eup %3202  ;;  %v1705_v3 = vpop.permute.xlu1 %1704 }
 0x538   : > { %v3205_v51 = vpop.eup %3204  ;;  %v1685_v52 = vsub.f32 %v3790_v23, %v3203_v1  ;;  %v1700_v61 = vpop.permute.xlu0 %1699 }
 0x539   : > { %v3207_v40 = vpop.eup %3206  ;;  %v1683_v36 = vsub.f32 %v3792_v46, %v3205_v51  ;;  %v3045_v46 = vld [vmem:[%s4216_s2 + $0x68] sm:$0xff]  }
 0x53a   : > { %v3209_v53 = vpop.eup %3208  ;;  %v1686_v27 = vsub.f32 %v3794_v45, %v3207_v40  ;;  %v1689_v12 = vmul.f32 %v3199_v38, %v1685_v52  ;;  %v3046_v45 = vld [vmem:[%s4216_s2 + $0x70] sm:$0xff]  }
 0x53b   : > { %v3211_v25 = vpop.eup %3210  ;;  %v1684_v60 = vsub.f32 %v3796_v56, %v3209_v53  ;;  %v1687_v57 = vmul.f32 %v3201_v54, %v1683_v36  ;;  %v3047_v56 = vld [vmem:[%s4216_s2 + $0x78] sm:$0xff]   ;;  %v1715_v47 = vpop.permute.xlu1 %1714 }
 0x53c   : > { %v3213_v28 = vpop.eup %3212  ;;  %v1690_v58 = vmul.f32 %v3211_v25, %v1686_v27  ;;  %v1693_v59 = vadd.f32 %v3203_v1, %v1689_v12  ;;  %v1710_v55 = vpop.permute.xlu0 %1709 }
 0x53d   : > { %v1688_v26 = vmul.f32 %v3213_v28, %v1684_v60  ;;  %v1691_v15 = vadd.f32 %v3205_v51, %v1687_v57 }
 0x53e   : > { %v1694_v5 = vadd.f32 %v3207_v40, %v1690_v58 }
 0x53f   : > { %v1692_v18 = vadd.f32 %v3209_v53, %v1688_v26  ;;  %v1725_v21 = vpop.permute.xlu1 %1724 }
 0x540   : > { %v1696_v4 = vpack.c.bf16 %v1694_v5, %v1693_v59  ;;  %v1720_v63 = vpop.permute.xlu0 %1719 }
 0x541   : > { %v1695_v23 = vpack.c.bf16 %v1692_v18, %v1691_v15 }
 0x543   : > { %2903 = vmatprep.subr.bf16.mxu0 %v1695_v23  ;;  %v1735_v31 = vpop.permute.xlu1 %1734 }
 0x544   : > { %2904 = vmatpush3.bf16.msra.mxu0 %v1695_v23  ;;  %v1730_v50 = vpop.permute.xlu0 %1729 }
 0x545   : > { %2905 = vmatprep.subr.bf16.mxu0 %v1696_v4 }
 0x548   : > { %2906 = vmatpush3.bf16.msra.mxu0 %v1696_v4 }
 0x54b   : > { %2908 = vmatmul.mubr.msk.bf16.vlgmr.msra.gmra.mrb[32].mxu0 %vm500_vm0, %v3045_v46 }
 0x54c   : > { %2911 = vmatprep.mubr.msk.bf16.mxu0 %vm500_vm0, %v3046_v45 }
 0x553   : > { %2912 = vmatmul.mubr.msk.bf16.gmra.mrb[36].mxu0 %vm500_vm0, %v3047_v56 }
 0x554   : > { %2915 = vmatprep.mubr.msk.bf16.mxu0 %vm500_vm0, %v3048_v6 }
 0x55b   : > { %2916 = vmatmul.mubr.msk.bf16.gmra.mrb[40].mxu0 %vm500_vm0, %v3049_v33 }
 0x55c   : > { %2919 = vmatprep.mubr.msk.bf16.mxu0 %vm500_vm0, %v3050_v7 }
 0x563   : > { %2920 = vmatmul.mubr.msk.bf16.gmra.mrb[44].mxu0 %vm500_vm0, %v3051_v22 }
 0x564   : > { %2923 = vmatprep.mubr.msk.bf16.mxu0 %vm500_vm0, %v3052_v29 }
 0x56b   : > { %2924 = vmatmul.mubr.msk.bf16.gmra.mrb[48].mxu0 %vm500_vm0, %v3053_v19 }
 0x61e   : > { %v2909_v62 = vpop.f32.mrb[32].mxu0 }
 0x61f   : > { %v1911_v32 = vpop.f32.mrb[33].mxu0  ;;  %v1920_v41 = vadd.f32 %v2909_v62, %v1710_v55 }
 0x620   : > { %v2910_v48 = vpop.f32.mrb[34].mxu0  ;;  %v1912_v37 = vadd.f32 %v1911_v32, %v1700_v61 }
 0x621   : > { %v1914_v0 = vpop.f32.mrb[35].mxu0  ;;  %v1923_v16 = vadd.f32 %v2910_v48, %v1715_v47  ;;  %v2012_v49 = vmul.f32 %v2003_v20, %v1920_v41 }
 0x622   : > { %v1915_v35 = vadd.f32 %v1914_v0, %v1705_v3  ;;  %v2010_v38 = vmul.f32 %v1993_v44, %v1912_v37 }
 0x623   : > { %v2013_v51 = vmul.f32 %v2008_v43, %v1923_v16 }
 0x624   : > { %v2011_v53 = vmul.f32 %v1998_v13, %v1915_v35 }
 0x626   : > { %v2913_v42 = vpop.f32.mrb[36].mxu0 }
 0x627   : > { %v1936_v2 = vadd.f32 %v2913_v42, %v1730_v50  ;;  %v1927_v39 = vpop.f32.mrb[37].mxu0 }
 0x628   : > { %v1928_v54 = vadd.f32 %v1927_v39, %v1720_v63  ;;  %v2914_v1 = vpop.f32.mrb[38].mxu0 }
 0x629   : > { %v3876_v52 = vadd.f32 %v2012_v49, %v1936_v2  ;;  %v1939_v40 = vadd.f32 %v2914_v1, %v1735_v31  ;;  %v1930_v36 = vpop.f32.mrb[39].mxu0 }
 0x62a   : > { %v3878_v27 = vadd.f32 %v2010_v38, %v1928_v54  ;;  %v1931_v12 = vadd.f32 %v1930_v36, %v1725_v21 }
 0x62b   : > { %v3880_v25 = vadd.f32 %v2013_v51, %v1939_v40  ;;  %v3255_v40 = vmov 683565275  }
 0x62c   : > { %v3882_v60 = vadd.f32 %v2011_v53, %v1931_v12 }
 0x62e   : > { %v3884_v57 = vpop.f32.mrb[40].mxu0 }
 0x62f   : > { %v3886_v28 = vpop.f32.mrb[41].mxu0 }
 0x630   : > { %v3888_v58 = vpop.f32.mrb[42].mxu0 }
 0x631   : > { %v3890_v59 = vpop.f32.mrb[43].mxu0 }
 0x636   : > { %v2921_v26 = vpop.f32.mrb[44].mxu0 }
 0x637   : > { %v1959_v15 = vpop.f32.mrb[45].mxu0  ;;  %v1968_v4 = vadd.f32 %v2921_v26, %v1770_v9  ;;  %v3256_v26 = vmov 2475754826  }
 0x638   : > { %v2922_v5 = vpop.f32.mrb[46].mxu0  ;;  %v1960_v23 = vadd.f32 %v1959_v15, %v1760_v34 }
 0x639   : > { %v1962_v18 = vpop.f32.mrb[47].mxu0  ;;  %v2020_v45 = vmul.f32 %v2003_v20, %v1968_v4  ;;  %v1971_v56 = vadd.f32 %v2922_v5, %v1775_v30  ;;  %v3257_v5 = vmov 2131351028   ;;  %v3258_v4 = vmov 2102212464  }
 0x63a   : > { %v2018_v7 = vmul.f32 %v1993_v44, %v1960_v23  ;;  %v1963_v22 = vadd.f32 %v1962_v18, %v1765_v8 }
 0x63b   : > { %v2021_v32 = vmul.f32 %v2008_v43, %v1971_v56 }
 0x63c   : > { %v2019_v20 = vmul.f32 %v1998_v13, %v1963_v22 }
 0x63e   : > { %v2925_v46 = vpop.f32.mrb[48].mxu0 }
 0x63f   : > { %v1984_v6 = vadd.f32 %v2925_v46, %v1790_v11  ;;  %v1975_v33 = vpop.f32.mrb[49].mxu0  ;;  %v3259_v46 = vmov 920167782  }
 0x640   : > { %v1976_v29 = vadd.f32 %v1975_v33, %v1780_v10  ;;  %v2926_v19 = vpop.f32.mrb[50].mxu0 }
 0x641   : > { %v3892_v61 = vadd.f32 %v2020_v45, %v1984_v6  ;;  %v1987_v3 = vadd.f32 %v2926_v19, %v1795_v17  ;;  %v1978_v55 = vpop.f32.mrb[51].mxu0 }
 0x642   : > { %v3894_v47 = vadd.f32 %v2018_v7, %v1976_v29  ;;  %v1979_v62 = vadd.f32 %v1978_v55, %v1785_v24  ;;  %v3260_v29 = vmov 1326507024  }
 0x643   : > { %v2234_v9 = vand.u32 2147483647, %v3892_v61  ;;  %v2237_v34 = vand.u32 2139095040, %v3892_v61  ;;  %v3902_v44 = vadd.f32 %v2021_v32, %v1987_v3  ;;  %vm2236_vm14 = vcmp.lt.s32.totalorder %v3892_v61, 0 }
 0x644   : > { %v2026_v30 = vand.u32 2147483647, %v3894_v47  ;;  %v2029_v11 = vand.u32 2139095040, %v3894_v47  ;;  %v3906_v43 = vadd.f32 %v2019_v20, %v1979_v62 }
 0x645   : > { %v2238_v8 = vshrl.u32 %v2237_v34, 23  ;;  %v2241_v10 = vand.u32 8388607, %v2234_v9  ;;  %v2341_v13 = vand.u32 2139095040, %v3902_v44  ;;  %v2338_v16 = vand.u32 2147483647, %v3902_v44 }
 0x646   : > { %v2030_v17 = vshrl.u32 %v2029_v11, 23  ;;  %v2033_v24 = vand.u32 8388607, %v2026_v30  ;;  %vm4008_vm15 = vcmp.le.f32.partialorder %v2234_v9, 0.7853982 }
 0x647   : > { %v2681_v63 = vadd.s32 4294967169, %v2238_v8  ;;  %v2242_v0 = vor.u32 8388608, %v2241_v10  ;;  %v2342_v50 = vshrl.u32 %v2341_v13, 23  ;;  %v3918_v1 = vand.u32 8388607, %v2338_v16 }
 0x648   : > { %v2673_v48 = vadd.s32 4294967169, %v2030_v17  ;;  %v2034_v41 = vor.u32 8388608, %v2033_v24 }
 0x649   : > { %v2244_v21 = vadd.s32 1, %v2681_v63  ;;  %v2685_v42 = vadd.s32 4294967169, %v2342_v50  ;;  %v3910_v31 = vshll.u32 %v2242_v0, 8 }
 0x64a   : > { %v2036_v37 = vadd.s32 1, %v2673_v48  ;;  %v3914_v54 = vshll.u32 %v2034_v41, 8 }
 0x64b   : > { %vm2245_vm1 = vcmp.gt.s32.totalorder %v2244_v21, 0  ;;  %v3921_v12 = vadd.s32 1, %v2685_v42 }
 0x64c   : > { %v2246_v35 = vsel %vm2245_vm1, %v2244_v21, 0  ;;  %vm2037_vm2 = vcmp.gt.s32.totalorder %v2036_v37, 0 }
 0x64d   : > { %v2247_v49 = vshrl.u32 %v2246_v35, 5  ;;  %v2248_v2 = vand.u32 31, %v2246_v35  ;;  %v2038_v39 = vsel %vm2037_vm2, %v2036_v37, 0  ;;  %vm2349_vm12 = vcmp.gt.s32.totalorder %v3921_v12, 0 }
 0x64e   : > { %v3912_v38 = vshrl.u32 %v2038_v39, 5  ;;  %v2040_v53 = vand.u32 31, %v2038_v39 }
 0x64f   : > { %v2249_v51 = vsub.s32 32, %v2248_v2  ;;  %v2251_v36 = vshll.u32 %v3255_v40, %v2248_v2  ;;  %v2254_v15 = vshll.u32 %v3256_v26, %v2248_v2  ;;  %v2257_v18 = vshll.u32 %v3257_v5, %v2248_v2 }
 0x650   : > { %v2260_v23 = vshll.u32 %v3258_v4, %v2248_v2  ;;  %v2263_v45 = vshll.u32 %v3259_v46, %v2248_v2  ;;  %vm2266_vm3 = vcmp.lt.s32.totalorder %v2247_v49, 1  ;;  %vm2267_vm4 = vcmp.lt.s32.totalorder %v2247_v49, 2 }
 0x651   : > { %v2252_v56 = vshrl.u32 %v3256_v26, %v2249_v51  ;;  %v2255_v6 = vshrl.u32 %v3257_v5, %v2249_v51  ;;  %v2258_v33 = vshrl.u32 %v3258_v4, %v2249_v51  ;;  %v2250_v7 = vshrl.u32 %v3255_v40, %v2249_v51 }
 0x652   : > { %v2261_v22 = vshrl.u32 %v3259_v46, %v2249_v51  ;;  %v2264_v19 = vshrl.u32 %v3260_v29, %v2249_v51  ;;  %v2041_v32 = vsub.s32 32, %v2040_v53  ;;  %vm2268_vm5 = vcmp.lt.s32.totalorder %v2247_v49, 3 }
 0x653   : > { %v2253_v3 = vor.u32 %v2252_v56, %v2251_v36  ;;  %v2256_v55 = vor.u32 %v2255_v6, %v2254_v15  ;;  %v2259_v62 = vor.u32 %v2258_v33, %v2257_v18  ;;  %vm2269_vm6 = vcmp.lt.s32.totalorder %v2247_v49, 4 }
 0x654   : > { %v2262_v34 = vor.u32 %v2261_v22, %v2260_v23  ;;  %v2265_v20 = vor.u32 %v2264_v19, %v2263_v45  ;;  %v2043_v13 = vshll.u32 %v3255_v40, %v2040_v53  ;;  %v2044_v41 = vshrl.u32 %v3256_v26, %v2041_v32 }
 0x655   : > { %v2270_v11 = vsel %vm2266_vm3, %v2250_v7, %v2253_v3  ;;  %v2271_v8 = vsel %vm2269_vm6, %v2259_v62, 2102212464  ;;  %v2274_v10 = vsel %vm2266_vm3, %v2253_v3, %v2256_v55  ;;  %v2278_v17 = vsel %vm2266_vm3, %v2256_v55, %v2259_v62 }
 0x656   : > { %v2272_v24 = vsel %vm2268_vm5, %v2256_v55, %v2271_v8  ;;  %v2275_v63 = vsel %vm2269_vm6, %v2262_v34, 920167782  ;;  %v2279_v48 = vsel %vm2269_vm6, %v2265_v20, 1326507024  ;;  %v2046_v37 = vshll.u32 %v3256_v26, %v2040_v53 }
 0x657   : > { %v2276_v0 = vsel %vm2268_vm5, %v2259_v62, %v2275_v63  ;;  %v2280_v21 = vsel %vm2268_vm5, %v2262_v34, %v2279_v48  ;;  %v2273_v50 = vsel %vm2267_vm4, %v2270_v11, %v2272_v24  ;;  %v2047_v2 = vshrl.u32 %v3257_v5, %v2041_v32 }
 0x658   : > { %v2277_v35 = vsel %vm2267_vm4, %v2274_v10, %v2276_v0  ;;  %v2281_v42 = vsel %vm2267_vm4, %v2278_v17, %v2280_v21  ;;  %v2045_v18 = vor.u32 %v2044_v41, %v2043_v13  ;;  %v2049_v45 = vshll.u32 %v3257_v5, %v2040_v53 }
 0x659   : > { %v3944_v39 = vmul.u32.u64.low %v3910_v31, %v2281_v42  ;;  %v3945_v51 = vmul.u32.u64.high %v3910_v31, %v2281_v42, %v3944_v39  ;;  %v3948_v36 = vmul.u32.u64.low %v3910_v31, %v2277_v35  ;;  %v3949_v15 = vmul.u32.u64.high %v3910_v31, %v2277_v35, %v3948_v36 }
 0x65a   : > { %v2048_v23 = vor.u32 %v2047_v2, %v2046_v37  ;;  %v2050_v56 = vshrl.u32 %v3258_v4, %v2041_v32  ;;  %v2042_v49 = vshrl.u32 %v3255_v40, %v2041_v32  ;;  %v2052_v6 = vshll.u32 %v3258_v4, %v2040_v53 }
 0x65b   : > { %v2053_v33 = vshrl.u32 %v3259_v46, %v2041_v32  ;;  %v2056_v7 = vshrl.u32 %v3260_v29, %v2041_v32  ;;  %v2289_v22 = vmul.u32 %v3910_v31, %v2273_v50  ;;  %v2055_v3 = vshll.u32 %v3259_v46, %v2040_v53 }
 0x65c   : > { %v2051_v19 = vor.u32 %v2050_v56, %v2049_v45  ;;  %vm2058_vm7 = vcmp.lt.s32.totalorder %v3912_v38, 1  ;;  %vm2291_vm8 = vc.u32 %v3945_v51, %v3948_v36  ;;  %v2292_v55 = vadd.s32 1, %v3949_v15 }
 0x65d   : > { %v2054_v62 = vor.u32 %v2053_v33, %v2052_v6  ;;  %vm2059_vm9 = vcmp.lt.s32.totalorder %v3912_v38, 2  ;;  %v2057_v34 = vor.u32 %v2056_v7, %v2055_v3  ;;  %vm2060_vm10 = vcmp.lt.s32.totalorder %v3912_v38, 3 }
 0x65e   : > { %vm2061_vm11 = vcmp.lt.s32.totalorder %v3912_v38, 4  ;;  %v2066_v32 = vsel %vm2058_vm7, %v2045_v18, %v2048_v23  ;;  %v2293_v31 = vsel %vm2291_vm8, %v2292_v55, %v3949_v15  ;;  %v2070_v11 = vsel %vm2058_vm7, %v2048_v23, %v2051_v19 }
 0x65f   : > { %v2063_v20 = vsel %vm2061_vm11, %v2051_v19, 2102212464  ;;  %v2067_v53 = vsel %vm2061_vm11, %v2054_v62, 920167782  ;;  %v2294_v8 = vadd.s32 %v2293_v31, %v2289_v22  ;;  %v2062_v10 = vsel %vm2058_vm7, %v2042_v49, %v2045_v18 }
 0x660   : > { %v2068_v17 = vsel %vm2060_vm10, %v2051_v19, %v2067_v53  ;;  %v2071_v24 = vsel %vm2061_vm11, %v2057_v34, 1326507024  ;;  %v2064_v63 = vsel %vm2060_vm10, %v2048_v23, %v2063_v20  ;;  %v2350_v42 = vsel %vm2349_vm12, %v3921_v12, 0 }
 0x661   : > { %v2069_v48 = vsel %vm2059_vm9, %v2066_v32, %v2068_v17  ;;  %v2072_v13 = vsel %vm2060_vm10, %v2054_v62, %v2071_v24  ;;  %v2295_v0 = vadd.s32 536870912, %v2294_v8  ;;  %v2065_v39 = vsel %vm2059_vm9, %v2062_v10, %v2064_v63 }
 0x662   : > { %v2073_v21 = vsel %vm2059_vm9, %v2070_v11, %v2072_v13  ;;  %v3974_v41 = vmul.u32.u64.low %v3914_v54, %v2069_v48  ;;  %v3975_v37 = vmul.u32.u64.high %v3914_v54, %v2069_v48, %v3974_v41  ;;  %v2352_v15 = vand.u32 31, %v2350_v42 }
 0x663   : > { %v3979_v50 = vmul.u32.u64.low %v3914_v54, %v2073_v21  ;;  %v3980_v35 = vmul.u32.u64.high %v3914_v54, %v2073_v21, %v3979_v50  ;;  %v2296_v2 = vshrl.u32 %v2295_v0, 30  ;;  %v2346_v45 = vor.u32 8388608, %v3918_v1 }
 0x664   : > { %v2084_v23 = vadd.s32 1, %v3975_v37  ;;  %v2081_v56 = vmul.u32 %v3914_v54, %v2065_v39  ;;  %v2353_v49 = vsub.s32 32, %v2352_v15  ;;  %v2133_v6 = vand.u32 2139095040, %v3906_v43 }
 0x665   : > { %v2297_v18 = vshll.u32 %v2296_v2, 30  ;;  %vm2083_vm13 = vc.u32 %v3980_v35, %v3974_v41  ;;  %v3993_v22 = vshll.u32 %v2346_v45, 8  ;;  %v2351_v62 = vshrl.u32 %v2350_v42, 5 }
 0x666   : > { %v2085_v12 = vsel %vm2083_vm13, %v2084_v23, %v3975_v37  ;;  %v2356_v1 = vshrl.u32 %v3256_v26, %v2353_v49  ;;  %v2359_v54 = vshrl.u32 %v3257_v5, %v2353_v49  ;;  %v2134_v3 = vshrl.u32 %v2133_v6, 23 }
 0x667   : > { %v2298_v33 = vsub.s32 %v2294_v8, %v2297_v18  ;;  %v2086_v7 = vadd.s32 %v2085_v12, %v2081_v56  ;;  %v2362_v34 = vshrl.u32 %v3258_v4, %v2353_v49  ;;  %v2365_v32 = vshrl.u32 %v3259_v46, %v2353_v49 }
 0x668   : > { %v2320_v31 = vsub.s32 4, %v2296_v2  ;;  %v2355_v53 = vshll.u32 %v3255_v40, %v2352_v15  ;;  %v2358_v11 = vshll.u32 %v3256_v26, %v2352_v15  ;;  %v2361_v10 = vshll.u32 %v3257_v5, %v2352_v15 }
 0x669   : > { %v2300_v38 = vsub.s32 0, %v2298_v33  ;;  %v2087_v19 = vadd.s32 536870912, %v2086_v7  ;;  %v2364_v17 = vshll.u32 %v3258_v4, %v2352_v15  ;;  %v2368_v24 = vshrl.u32 %v3260_v29, %v2353_v49 }
 0x66a   : > { %v2290_v48 = vadd.s32 %v3948_v36, %v3945_v51  ;;  %v2357_v0 = vor.u32 %v2356_v1, %v2355_v53  ;;  %v2360_v21 = vor.u32 %v2359_v54, %v2358_v11  ;;  %v2363_v50 = vor.u32 %v2362_v34, %v2361_v10 }
 0x66b   : > { %v2682_v55 = vmin.u32 %v2300_v38, %v2298_v33  ;;  %v3999_v20 = vshrl.u32 %v2087_v19, 30  ;;  %v2366_v42 = vor.u32 %v2365_v32, %v2364_v17  ;;  %v2367_v39 = vshll.u32 %v3259_v46, %v2352_v15 }
 0x66c   : > { %v2321_v18 = vsel %vm2236_vm14, %v2320_v31, %v2296_v2  ;;  %v2354_v9 = vshrl.u32 %v3255_v40, %v2353_v49  ;;  %vm2370_vm0 = vcmp.lt.s32.totalorder %v2351_v62, 1  ;;  %vm2371_vm2 = vcmp.lt.s32.totalorder %v2351_v62, 2 }
 0x66d   : > { %v2302_v8 = vclz %v2682_v55  ;;  %v2089_v13 = vshll.u32 %v3999_v20, 30  ;;  %v2369_v45 = vor.u32 %v2368_v24, %v2367_v39  ;;  %vm2372_vm3 = vcmp.lt.s32.totalorder %v2351_v62, 3 }
 0x66e   : > { %vm2373_vm4 = vcmp.lt.s32.totalorder %v2351_v62, 4  ;;  %v2378_v56 = vsel %vm2370_vm0, %v2357_v0, %v2360_v21  ;;  %v2382_v19 = vsel %vm2370_vm0, %v2360_v21, %v2363_v50  ;;  %vm2028_vm5 = vcmp.lt.s32.totalorder %v3894_v47, 0 }
 0x66f   : > { %v2683_v37 = vadd.s32 4294967294, %v2302_v8  ;;  %v4018_v23 = vsub.s32 %v2086_v7, %v2089_v13  ;;  %v2375_v12 = vsel %vm2373_vm4, %v2363_v50, 2102212464  ;;  %v2379_v38 = vsel %vm2373_vm4, %v2366_v42, 920167782 }
 0x670   : > { %v2380_v49 = vsel %vm2372_vm3, %v2363_v50, %v2379_v38  ;;  %v2383_v34 = vsel %vm2373_vm4, %v2369_v45, 1326507024  ;;  %v2374_v31 = vsel %vm2370_vm0, %v2354_v9, %v2357_v0  ;;  %v2376_v53 = vsel %vm2372_vm3, %v2360_v21, %v2375_v12  ;;  %v4049_v12 = vpop.permute.xlu0 %1739 }
 0x671   : > { %vm2684_vm1 = vcmp.lt.s32.totalorder %v2683_v37, 0  ;;  %v2092_v36 = vsub.s32 0, %v4018_v23  ;;  %v2381_v55 = vsel %vm2371_vm2, %v2378_v56, %v2380_v49  ;;  %v2677_v11 = vadd.s32 4294967169, %v2134_v3 }
 0x672   : > { %v2305_v51 = vsel %vm2684_vm1, 0, %v2683_v37  ;;  %v2323_v10 = vsel %vm4008_vm15, 0, %v2321_v18  ;;  %v2384_v17 = vsel %vm2372_vm3, %v2366_v42, %v2383_v34  ;;  %v2377_v0 = vsel %vm2371_vm2, %v2374_v31, %v2376_v53 }
 0x673   : > { %v2306_v6 = vsub.s32 32, %v2305_v51  ;;  %v2310_v15 = vsub.s32 4294967266, %v2305_v51  ;;  %v2307_v2 = vshll.u32 %v2298_v33, %v2305_v51  ;;  %v2674_v7 = vmin.u32 %v2092_v36, %v4018_v23 }
 0x674   : > { %v4035_v13 = vmul.u32.u64.low %v3993_v22, %v2381_v55  ;;  %v4036_v37 = vmul.u32.u64.high %v3993_v22, %v2381_v55, %v4035_v13  ;;  %v2327_v39 = vadd.s32 3, %v2323_v10  ;;  %v2082_v18 = vadd.s32 %v3974_v41, %v3980_v35 }
 0x675   : > { %v2308_v1 = vshrl.u32 %v2290_v48, %v2306_v6  ;;  %v2311_v54 = vadd.s32 127, %v2310_v15  ;;  %v2094_v32 = vclz %v2674_v7  ;;  %v2385_v48 = vsel %vm2371_vm2, %v2382_v19, %v2384_v17 }
 0x676   : > { %v4041_v3 = vmul.u32.u64.low %v3993_v22, %v2385_v48  ;;  %v4042_v21 = vmul.u32.u64.high %v3993_v22, %v2385_v48, %v4041_v3  ;;  %v2140_v42 = vadd.s32 1, %v2677_v11  ;;  %v2112_v36 = vsub.s32 4, %v3999_v20 }
 0x677   : > { %v2309_v33 = vor.u32 %v2308_v1, %v2307_v2  ;;  %v2312_v8 = vshll.u32 %v2311_v54, 23  ;;  %v2675_v24 = vadd.s32 4294967294, %v2094_v32  ;;  %v2393_v62 = vmul.u32 %v3993_v22, %v2377_v0 }
 0x678   : > { %v2396_v15 = vadd.s32 1, %v4036_v37  ;;  %vm2395_vm7 = vc.u32 %v4042_v21, %v4035_v13  ;;  %vm2141_vm8 = vcmp.gt.s32.totalorder %v2140_v42, 0  ;;  %v2113_v22 = vsel %vm2028_vm5, %v2112_v36, %v3999_v20 }
 0x679   : > { %v2313_v50 = vor.u32 4788187, %v2312_v8  ;;  %vm2676_vm6 = vcmp.lt.s32.totalorder %v2675_v24, 0  ;;  %v2316_v45 = vcvt.s32.f32 %v2309_v33  ;;  %v2142_v49 = vsel %vm2141_vm8, %v2140_v42, 0  ;;  %v1750_v8 = vpop.permute.xlu0 %1749 }
 0x67a   : > { %v2097_v51 = vsel %vm2676_vm6, 0, %v2675_v24  ;;  %v2397_v7 = vsel %vm2395_vm7, %v2396_v15, %v4036_v37  ;;  %v2144_v54 = vand.u32 31, %v2142_v49  ;;  %vm4060_vm9 = vcmp.le.f32.partialorder %v2026_v30, 0.7853982 }
 0x67b   : > { %v2314_v9 = vand.u32 2147483647, %v2313_v50  ;;  %v2098_v56 = vsub.s32 32, %v2097_v51  ;;  %v2102_v6 = vsub.s32 4294967266, %v2097_v51  ;;  %v2099_v2 = vshll.u32 %v4018_v23, %v2097_v51 }
 0x67c   : > { %v2398_v1 = vadd.s32 %v2397_v7, %v2393_v62  ;;  %v2130_v53 = vand.u32 2147483647, %v3906_v43  ;;  %v2145_v11 = vsub.s32 32, %v2144_v54  ;;  %v2115_v30 = vsel %vm4060_vm9, 0, %v2113_v22 }
 0x67d   : > { %v2317_v38 = vmul.f32 %v2316_v45, %v2314_v9  ;;  %v2100_v41 = vshrl.u32 %v2082_v18, %v2098_v56  ;;  %v2103_v35 = vadd.s32 127, %v2102_v6  ;;  %v4072_v10 = vand.u32 3, %v2327_v39 }
 0x67e   : > { %v2399_v31 = vadd.s32 536870912, %v2398_v1  ;;  %v4077_v24 = vadd.f32 %v3884_v57, %v1750_v8  ;;  %v2119_v50 = vadd.s32 3, %v2115_v30  ;;  %v2137_v0 = vand.u32 8388607, %v2130_v53 }
 0x67f   : > { %v2318_v19 = vxor.u32 2147483648, %v2317_v38  ;;  %v2101_v55 = vor.u32 %v2100_v41, %v2099_v2  ;;  %v2104_v34 = vshll.u32 %v2103_v35, 23  ;;  %v2148_v3 = vshrl.u32 %v3256_v26, %v2145_v11 }
 0x680   : > { %v4074_v17 = vshrl.u32 %v2399_v31, 30  ;;  %v2151_v39 = vshrl.u32 %v3257_v5, %v2145_v11  ;;  %v2156_v42 = vshll.u32 %v3258_v4, %v2144_v54  ;;  %v2157_v9 = vshrl.u32 %v3259_v46, %v2145_v11 }
 0x681   : > { %v2319_v32 = vsel %vm2236_vm14, %v2318_v19, %v2317_v38  ;;  %v2105_v33 = vor.u32 4788187, %v2104_v34  ;;  %v2108_v37 = vcvt.s32.f32 %v2101_v55  ;;  %vm2333_vm10 = vcmp.eq.s32.totalorder %v4072_v10, 2 }
 0x682   : > { %v2322_v20 = vsel %vm4008_vm15, %v3892_v61, %v2319_v32  ;;  %v2401_v63 = vshll.u32 %v4074_v17, 30  ;;  %v4089_v45 = vshrl.u32 %v2142_v49, 5  ;;  %v2147_v51 = vshll.u32 %v3255_v40, %v2144_v54 }
 0x683   : > { %3214 = vcosq.f32 %v2322_v20  ;;  %v2106_v48 = vand.u32 2147483647, %v2105_v33  ;;  %v2154_v36 = vshrl.u32 %v3258_v4, %v2145_v11  ;;  %vm2330_vm11 = vcmp.eq.s32.totalorder %v4072_v10, 0 }
 0x684   : > { %3216 = vsinq.f32 %v2322_v20  ;;  %v4087_v57 = vsub.s32 %v2398_v1, %v2401_v63  ;;  %v2150_v6 = vshll.u32 %v3256_v26, %v2144_v54  ;;  %v2158_v62 = vor.u32 %v2157_v9, %v2156_v42 }
 0x685   : > { %v2109_v18 = vmul.f32 %v2108_v37, %v2106_v48  ;;  %v2160_v15 = vshrl.u32 %v3260_v29, %v2145_v11  ;;  %vm2329_vm12 = vcmp.lt.s32.totalorder %v4072_v10, 2  ;;  %v4097_v38 = vand.u32 3, %v2119_v50 }
 0x686   : > { %v2404_v2 = vsub.s32 0, %v4087_v57  ;;  %v2138_v41 = vor.u32 8388608, %v2137_v0  ;;  %v2153_v35 = vshll.u32 %v3257_v5, %v2144_v54  ;;  %vm2326_vm13 = vweird.f32 %v3892_v61 }
 0x687   : > { %v2110_v56 = vxor.u32 2147483648, %v2109_v18  ;;  %v2149_v7 = vor.u32 %v2148_v3, %v2147_v51  ;;  %v2152_v49 = vor.u32 %v2151_v39, %v2150_v6  ;;  %v2159_v26 = vshll.u32 %v3259_v46, %v2144_v54 }
 0x688   : > { %v2686_v19 = vmin.u32 %v2404_v2, %v4087_v57  ;;  %v2155_v22 = vor.u32 %v2154_v36, %v2153_v35  ;;  %vm2165_vm14 = vcmp.lt.s32.totalorder %v4089_v45, 4  ;;  %v2394_v5 = vadd.s32 %v4035_v13, %v4042_v21 }
 0x689   : > { %v2111_v4 = vsel %vm2028_vm5, %v2110_v56, %v2109_v18  ;;  %v2161_v1 = vor.u32 %v2160_v15, %v2159_v26  ;;  %v2171_v55 = vsel %vm2165_vm14, %v2158_v62, 920167782  ;;  %v2146_v54 = vshrl.u32 %v3255_v40, %v2145_v11 }
 0x68a   : > { %v2114_v29 = vsel %vm4060_vm9, %v3894_v47, %v2111_v4  ;;  %v2406_v46 = vclz %v2686_v19  ;;  %v4115_v23 = vshll.u32 %v2138_v41, 8  ;;  %vm2162_vm15 = vcmp.lt.s32.totalorder %v4089_v45, 1 }
 0x68b   : > { %3218 = vcosq.f32 %v2114_v29  ;;  %vm2163_vm0 = vcmp.lt.s32.totalorder %v4089_v45, 2  ;;  %vm2164_vm1 = vcmp.lt.s32.totalorder %v4089_v45, 3  ;;  %v2170_v20 = vsel %vm2162_vm15, %v2149_v7, %v2152_v49 }
 0x68c   : > { %3220 = vsinq.f32 %v2114_v29  ;;  %v2687_v21 = vadd.s32 4294967294, %v2406_v46  ;;  %v2172_v33 = vsel %vm2164_vm1, %v2155_v22, %v2171_v55  ;;  %v2167_v40 = vsel %vm2165_vm14, %v2155_v22, 2102212464 }
 0x68d   : > { %v3215_v34 = vpop.eup %3214  ;;  %v2174_v11 = vsel %vm2162_vm15, %v2152_v49, %v2155_v22  ;;  %v2175_v8 = vsel %vm2165_vm14, %v2161_v1, 1326507024  ;;  %v2166_v37 = vsel %vm2162_vm15, %v2146_v54, %v2149_v7  ;;  %v2173_v3 = vsel %vm2163_vm0, %v2170_v20, %v2172_v33 }
 0x68e   : > { %v3217_v32 = vpop.eup %3216  ;;  %v2334_v31 = vxor.u32 2147483648, %v3215_v34  ;;  %vm2688_vm2 = vcmp.lt.s32.totalorder %v2687_v21, 0  ;;  %v2176_v50 = vsel %vm2164_vm1, %v2158_v62, %v2175_v8  ;;  %v2168_v51 = vsel %vm2164_vm1, %v2152_v49, %v2167_v40 }
 0x68f   : > { %v2331_v13 = vxor.u32 2147483648, %v3217_v32  ;;  %v2409_v0 = vsel %vm2688_vm2, 0, %v2687_v21  ;;  %v2177_v18 = vsel %vm2163_vm0, %v2174_v11, %v2176_v50  ;;  %v1944_v35 = vadd.f32 %v3886_v28, %v4049_v12 }
 0x690   : > { %v2335_v30 = vsel %vm2333_vm10, %v2334_v31, %v3217_v32  ;;  %v2410_v42 = vsub.s32 32, %v2409_v0  ;;  %v2414_v9 = vsub.s32 4294967266, %v2409_v0  ;;  %v2411_v10 = vshll.u32 %v4087_v57, %v2409_v0 }
 0x691   : > { %v2332_v48 = vsel %vm2330_vm11, %v3215_v34, %v2331_v13  ;;  %v4145_v56 = vmul.u32.u64.low %v4115_v23, %v2177_v18  ;;  %v4146_v6 = vmul.u32.u64.high %v4115_v23, %v2177_v18, %v4145_v56  ;;  %vm2454_vm3 = vcmask 31744  }
 0x692   : > { %v2336_v63 = vsel %vm2329_vm12, %v2332_v48, %v2335_v30  ;;  %v2412_v62 = vshrl.u32 %v2394_v5, %v2410_v42  ;;  %v2415_v15 = vadd.s32 127, %v2414_v9  ;;  %v2169_v26 = vsel %vm2163_vm0, %v2166_v37, %v2168_v51 }
 0x693   : > { %v2337_v39 = vsel %vm2326_vm13, nan, %v2336_v63  ;;  %v4149_v2 = vmul.u32.u64.low %v4115_v23, %v2173_v3  ;;  %v4150_v61 = vmul.u32.u64.high %v4115_v23, %v2173_v3, %v4149_v2  ;;  %vm2125_vm4 = vcmp.eq.s32.totalorder %v4097_v38, 2  ;;  %v1745_v63 = vpop.permute.xlu1 %1744 }
 0x694   : > { %v2444_v36 = vmul.f32 %v2337_v39, %v4077_v24  ;;  %v2413_v7 = vor.u32 %v2412_v62, %v2411_v10  ;;  %v2416_v49 = vshll.u32 %v2415_v15, 23  ;;  %vm2122_vm6 = vcmp.eq.s32.totalorder %v4097_v38, 0 }
 0x695   : > { %v3219_v41 = vpop.eup %3218  ;;  %vm2187_vm5 = vc.u32 %v4146_v6, %v4149_v2  ;;  %v2188_v19 = vadd.s32 1, %v4150_v61  ;;  %vm2118_vm7 = vweird.f32 %v3894_v47  ;;  %vm2121_vm8 = vcmp.lt.s32.totalorder %v4097_v38, 2 }
 0x696   : > { %v2448_v4 = vadd.f32 %v2444_v36, %v3876_v52  ;;  %v3221_v24 = vpop.eup %3220  ;;  %v2126_v57 = vxor.u32 2147483648, %v3219_v41  ;;  %v2417_v12 = vor.u32 4788187, %v2416_v49  ;;  %v2185_v22 = vmul.u32 %v4115_v23, %v2169_v26 }
 0x697   : > { %v2123_v28 = vxor.u32 2147483648, %v3221_v24  ;;  %v2420_v55 = vcvt.s32.f32 %v2413_v7  ;;  %v2189_v34 = vsel %vm2187_vm5, %v2188_v19, %v4150_v61  ;;  %v2424_v13 = vsub.s32 4, %v4074_v17  ;;  %v1755_v51 = vpop.permute.xlu1 %1754 }
 0x698   : > { %v2452_v29 = vadd.f32 %v2448_v4, %v3333_v14  ;;  %v2127_v52 = vsel %vm2125_vm4, %v2126_v57, %v3221_v24  ;;  %v2418_v1 = vand.u32 2147483647, %v2417_v12  ;;  %v2190_v54 = vadd.s32 %v2189_v34, %v2185_v22 }
 0x699   : > { %v2124_v45 = vsel %vm2122_vm6, %v3219_v41, %v2123_v28  ;;  %vm2340_vm9 = vcmp.lt.s32.totalorder %v3902_v44, 0  ;;  %vm2339_vm10 = vcmp.le.f32.partialorder %v2338_v16, 0.7853982  ;;  %v2186_v10 = vadd.s32 %v4149_v2, %v4146_v6 }
 0x69a   : > { %2457 = vst.msk [vmem:[%s4161_s29 + $0x10] sm:$0xff] %vm2454_vm3, %v2452_v29  ;;  %v2128_v5 = vsel %vm2121_vm8, %v2124_v45, %v2127_v52  ;;  %v2421_v31 = vmul.f32 %v2420_v55, %v2418_v1  ;;  %v2191_v21 = vadd.s32 536870912, %v2190_v54  ;;  %v2425_v30 = vsel %vm2340_vm9, %v2424_v13, %v4074_v17 }
 0x69b   : > { %v2129_v46 = vsel %vm2118_vm7, nan, %v2128_v5  ;;  %v2427_v8 = vsel %vm2339_vm10, 0, %v2425_v30  ;;  %v1955_v15 = vadd.f32 %v3888_v58, %v1755_v51  ;;  %vm2430_vm14 = vweird.f32 %v3902_v44 }
 0x69c   : > { %v2442_v32 = vmul.f32 %v2129_v46, %v1944_v35  ;;  %v2422_v20 = vxor.u32 2147483648, %v2421_v31  ;;  %v2192_v38 = vshrl.u32 %v2191_v21, 30  ;;  %v2431_v37 = vadd.s32 3, %v2427_v8 }
 0x69d   : > { %vm2132_vm0 = vcmp.lt.s32.totalorder %v3906_v43, 0  ;;  %vm2131_vm1 = vcmp.le.f32.partialorder %v2130_v53, 0.7853982  ;;  %v1947_v53 = vadd.f32 %v3890_v59, %v1745_v63  ;;  %vm2222_vm6 = vweird.f32 %v3906_v43 }
 0x69e   : > { %v2446_v47 = vadd.f32 %v2442_v32, %v3878_v27  ;;  %v2423_v33 = vsel %vm2340_vm9, %v2422_v20, %v2421_v31  ;;  %v2193_v11 = vshll.u32 %v2192_v38, 30  ;;  %v2432_v3 = vand.u32 3, %v2431_v37 }
 0x69f   : > { %v2426_v40 = vsel %vm2339_vm10, %v3902_v44, %v2423_v33  ;;  %v2216_v52 = vsub.s32 4, %v2192_v38 }
 0x6a0   : > { %v2450_v23 = vadd.f32 %v2446_v47, %v3333_v14  ;;  %3222 = vcosq.f32 %v2426_v40  ;;  %v2194_v27 = vsub.s32 %v2190_v54, %v2193_v11  ;;  %vm2434_vm12 = vcmp.eq.s32.totalorder %v2432_v3, 0 }
 0x6a1   : > { %3224 = vsinq.f32 %v2426_v40  ;;  %vm2437_vm13 = vcmp.eq.s32.totalorder %v2432_v3, 2  ;;  %vm2433_vm15 = vcmp.lt.s32.totalorder %v2432_v3, 2  ;;  %v2217_v45 = vsel %vm2132_vm0, %v2216_v52, %v2192_v38 }
 0x6a2   : > { %2455 = vst.msk [vmem:[%s4161_s29] sm:$0xff] %vm2454_vm3, %v2450_v23  ;;  %v2196_v48 = vsub.s32 0, %v2194_v27 }
 0x6a4   : > { %v2678_v50 = vmin.u32 %v2196_v48, %v2194_v27 }
 0x6a6   : > { %v2198_v0 = vclz %v2678_v50 }
 0x6a8   : > { %v2679_v18 = vadd.s32 4294967294, %v2198_v0 }
 0x6aa   : > { %v3223_v16 = vpop.eup %3222  ;;  %vm2680_vm11 = vcmp.lt.s32.totalorder %v2679_v18, 0 }
 0x6ab   : > { %v3225_v39 = vpop.eup %3224  ;;  %v2438_v42 = vxor.u32 2147483648, %v3223_v16  ;;  %v2201_v9 = vsel %vm2680_vm11, 0, %v2679_v18 }
 0x6ac   : > { %v2435_v17 = vxor.u32 2147483648, %v3225_v39  ;;  %v2202_v56 = vsub.s32 32, %v2201_v9  ;;  %v2206_v62 = vsub.s32 4294967266, %v2201_v9  ;;  %v2203_v35 = vshll.u32 %v2194_v27, %v2201_v9 }
 0x6ad   : > { %v2439_v36 = vsel %vm2437_vm13, %v2438_v42, %v3225_v39 }
 0x6ae   : > { %v2436_v61 = vsel %vm2434_vm12, %v3223_v16, %v2435_v17  ;;  %v2204_v4 = vshrl.u32 %v2186_v10, %v2202_v56  ;;  %v2207_v24 = vadd.s32 127, %v2206_v62 }
 0x6af   : > { %v2440_v41 = vsel %vm2433_vm15, %v2436_v61, %v2439_v36 }
 0x6b0   : > { %v2441_v57 = vsel %vm2430_vm14, nan, %v2440_v41  ;;  %v2205_v49 = vor.u32 %v2204_v4, %v2203_v35  ;;  %v2208_v26 = vshll.u32 %v2207_v24, 23 }
 0x6b1   : > { %v2445_v7 = vmul.f32 %v2441_v57, %v1955_v15 }
 0x6b2   : > { %v2209_v6 = vor.u32 4788187, %v2208_v26  ;;  %v2212_v58 = vcvt.s32.f32 %v2205_v49 }
 0x6b3   : > { %v2449_v29 = vadd.f32 %v2445_v7, %v3880_v25  ;;  %v2219_v25 = vsel %vm2131_vm1, 0, %v2217_v45 }
 0x6b4   : > { %v2210_v28 = vand.u32 2147483647, %v2209_v6  ;;  %v2223_v5 = vadd.s32 3, %v2219_v25 }
 0x6b5   : > { %v2453_v2 = vadd.f32 %v2449_v29, %v3333_v14 }
 0x6b6   : > { %v2213_v44 = vmul.f32 %v2212_v58, %v2210_v28  ;;  %v2224_v1 = vand.u32 3, %v2223_v5 }
 0x6b7   : > { %2458 = vst.msk [vmem:[%s4161_s29 + $0x18] sm:$0xff] %vm2454_vm3, %v2453_v2 }
 0x6b8   : > { %v2214_v12 = vxor.u32 2147483648, %v2213_v44  ;;  %vm2229_vm2 = vcmp.eq.s32.totalorder %v2224_v1, 2  ;;  %vm2226_vm4 = vcmp.eq.s32.totalorder %v2224_v1, 0  ;;  %vm2225_vm5 = vcmp.lt.s32.totalorder %v2224_v1, 2 }
 0x6ba   : > { %v2215_v19 = vsel %vm2132_vm0, %v2214_v12, %v2213_v44 }
 0x6bb   : > { %v2218_v22 = vsel %vm2131_vm1, %v3906_v43, %v2215_v19 }
 0x6bc   : > { %3226 = vcosq.f32 %v2218_v22 }
 0x6bd   : > { %3228 = vsinq.f32 %v2218_v22 }
 0x6c6   : > { %v3227_v55 = vpop.eup %3226 }
 0x6c7   : > { %v3229_v34 = vpop.eup %3228  ;;  %v2230_v46 = vxor.u32 2147483648, %v3227_v55 }
 0x6c8   : > { %v2227_v54 = vxor.u32 2147483648, %v3229_v34 }
 0x6c9   : > { %v2231_v32 = vsel %vm2229_vm2, %v2230_v46, %v3229_v34 }
 0x6ca   : > { %v2228_v31 = vsel %vm2226_vm4, %v3227_v55, %v2227_v54 }
 0x6cb   : > { %v2232_v13 = vsel %vm2225_vm5, %v2228_v31, %v2231_v32 }
 0x6cc   : > { %v2233_v21 = vsel %vm2222_vm6, nan, %v2232_v13 }
 0x6cd   : > { %v2443_v47 = vmul.f32 %v2233_v21, %v1947_v53 }
 0x6cf   : > { %v2447_v20 = vadd.f32 %v2443_v47, %v3882_v60 }
 0x6d1   : > { %v2451_v38 = vadd.f32 %v2447_v20, %v3333_v14 }
 0x6d3   : > { %2456 = vst.msk [vmem:[%s4161_s29 + $0x8] sm:$0xff] %vm2454_vm3, %v2451_v38 }
 0x6d4 PF: > { %s14_s17 = sadd.s32 1, %s3252_s17   ;;  %s4223_s15 = smov %s3248_s16 }
 0x6d5   : > { %p11_p5 = scmp.ge.s32.totalorder %s14_s17, 4   ;;  %s4224_s16 = smov %s4226_s18 }
 0x6d7   :  { %13 = sbr.rel (!%p11_p5) target bundleno = 2 (0x2), region = 66 }

</bundles_post_ra>
